<compile_context>
chip_gen: v7x
topology: tpu7x:2x2x1
jax: 0.10.0
libtpu: 0.0.40
codegen_flags: <defaults>
</compile_context>

<pallas_src>
import functools

import jax
import jax.numpy as jnp
from jax import lax
from jax.experimental import pallas as pl
from jax.experimental.pallas import tpu as pltpu

K = 7
PAD = K // 2
BN_EPS = 1e-5


# ----------------------------------------------------------------------------
# Pallas kernel: one batch element per grid step, everything in (H, W*C) layout.
# ----------------------------------------------------------------------------
def pfc_kernel(xh_ref, w1b_ref, b1_ref, s1_ref, t1_ref,
               wdb_ref, bd_ref, s2_ref, t2_ref,
               wpb_ref, bp_ref, s3_ref, t3_ref,
               out_ref, scr_ref, *, H, W, C):
    WC = W * C

    # ---- input layer: 3->C 7x7 conv as K banded MXU matmuls over row windows ----
    acc = jnp.zeros((H, WC), jnp.float32)
    for kh in range(K):
        rows = xh_ref[0, kh:kh + H, :]                          # (H, W*CIN)
        acc = acc + jnp.dot(rows, w1b_ref[kh],
                            preferred_element_type=jnp.float32)
    x1 = jnp.maximum(acc + b1_ref[...], 0.0)                    # bias + ReLU
    x1 = x1 * s1_ref[...] + t1_ref[...]                         # BN (eval, folded)

    # ---- depthwise 7x7 conv: row-padded VMEM scratch + K banded MXU matmuls ----
    # Only the halo rows are zeroed; the interior is fully overwritten every step.
    scr_ref[0:PAD, :] = jnp.zeros((PAD, WC), jnp.float32)
    scr_ref[PAD + H:PAD + H + PAD, :] = jnp.zeros((PAD, WC), jnp.float32)
    scr_ref[PAD:PAD + H, :] = x1
    acc2 = jnp.zeros((H, WC), jnp.float32)
    for kh in range(K):
        rows = scr_ref[kh:kh + H, :]                            # (H, W*C) lane-aligned
        acc2 = acc2 + jnp.dot(rows, wdb_ref[kh],
                              preferred_element_type=jnp.float32)
    xd = jnp.maximum(acc2 + bd_ref[...], 0.0)
    xd = xd * s2_ref[...] + t2_ref[...]
    xd = xd + x1                                                # residual add

    # ---- pointwise 1x1 conv: one block-diagonal MXU matmul ----
    xp = jnp.dot(xd, wpb_ref[...], preferred_element_type=jnp.float32)
    xp = jnp.maximum(xp + bp_ref[...], 0.0)
    xp = xp * s3_ref[...] + t3_ref[...]

    out_ref[0] = xp                                             # (H, W*C) lane-dense store


# ----------------------------------------------------------------------------
# Wrapper-side "conv as matmul" weight plumbing (pure layout work, no compute).
# ----------------------------------------------------------------------------
def _conv_row_band(w_kh, W, pad):
    """w_kh: (Kw, CIN, COUT) -> band (W*CIN, W*COUT) such that
    (row @ band)[w*COUT + f] = sum_{kw,cin valid} row[(w+kw-pad)*CIN + cin] * w_kh[kw,cin,f]."""
    Kw, CIN, COUT = w_kh.shape
    w_idx = jnp.arange(W)[:, None, None, None]
    kw_idx = jnp.arange(Kw)[None, :, None, None]
    cin_idx = jnp.arange(CIN)[None, None, :, None]
    f_idx = jnp.arange(COUT)[None, None, None, :]
    w2 = w_idx + kw_idx - pad                                   # input column index
    valid = (w2 >= 0) & (w2 < W)
    rows = jnp.clip(w2, 0, W - 1) * CIN + cin_idx
    cols = w_idx * COUT + f_idx
    vals = jnp.where(valid, w_kh[None, :, :, :], 0.0)
    shape = (W, Kw, CIN, COUT)
    rows = jnp.broadcast_to(rows, shape).ravel()
    cols = jnp.broadcast_to(cols, shape).ravel()
    vals = jnp.broadcast_to(vals, shape).ravel()
    return jnp.zeros((W * CIN, W * COUT), jnp.float32).at[rows, cols].add(vals)


def _dw_row_band(wd_kh, W, pad):
    """wd_kh: (Kw, C) -> band (W*C, W*C) with
    band[(w+kw-pad)*C + c, w*C + c] = wd_kh[kw, c] (valid taps only)."""
    Kw, C = wd_kh.shape
    w_idx = jnp.arange(W)[:, None, None]
    kw_idx = jnp.arange(Kw)[None, :, None]
    c_idx = jnp.arange(C)[None, None, :]
    w2 = w_idx + kw_idx - pad
    valid = (w2 >= 0) & (w2 < W)
    rows = jnp.clip(w2, 0, W - 1) * C + c_idx
    cols = w_idx * C + c_idx
    vals = jnp.where(valid, wd_kh[None, :, :], 0.0)
    shape = (W, Kw, C)
    rows = jnp.broadcast_to(rows, shape).ravel()
    cols = jnp.broadcast_to(cols, shape).ravel()
    vals = jnp.broadcast_to(vals, shape).ravel()
    return jnp.zeros((W * C, W * C), jnp.float32).at[rows, cols].add(vals)


def pfc_forward(x_nchw, params):
    """x_nchw: (N, 3, H, W) float32. Returns (N, C, H, W)."""
    N, CIN, H, W = x_nchw.shape
    C = params['C']
    WC = W * C
    Hp = H + 2 * PAD

    # NHWC -> flatten (w, cin) into the lane axis; pad rows only (width padding is
    # already folded into the banded weights).
    x = jnp.transpose(x_nchw, (0, 2, 3, 1)).astype(jnp.float32)
    x = x.reshape(N, H, W * CIN)
    xh = jnp.pad(x, ((0, 0), (PAD, PAD), (0, 0)))

    kernel = functools.partial(pfc_kernel, H=H, W=W, C=C)
    vec = pl.BlockSpec((1, WC), lambda n: (0, 0))

    out = pl.pallas_call(
        kernel,
        out_shape=jax.ShapeDtypeStruct((N, H, WC), jnp.float32),
        grid_spec=pltpu.PrefetchScalarGridSpec(
            num_scalar_prefetch=0,
            grid=(N,),
            in_specs=[
                pl.BlockSpec((1, Hp, W * CIN), lambda n: (n, 0, 0)),   # row-padded input
                pl.BlockSpec((K, W * CIN, WC), lambda n: (0, 0, 0)),   # conv1 banded weights
                vec, vec, vec,                                         # b1, bn1 scale/shift
                pl.BlockSpec((K, WC, WC), lambda n: (0, 0, 0)),        # depthwise banded weights
                vec, vec, vec,                                         # bd, bn2 scale/shift
                pl.BlockSpec((WC, WC), lambda n: (0, 0)),              # pointwise block-diag
                vec, vec, vec,                                         # bp, bn3 scale/shift
            ],
            out_specs=pl.BlockSpec((1, H, WC), lambda n: (n, 0, 0)),   # lane-dense output
            scratch_shapes=[pltpu.VMEM((Hp, WC), jnp.float32)],
        ),
        compiler_params=pltpu.CompilerParams(
            dimension_semantics=("parallel",)),
    )(xh,
      params['w1b'], params['b1v'], params['s1v'], params['t1v'],
      params['wdb'], params['bdv'], params['s2v'], params['t2v'],
      params['wpb'], params['bpv'], params['s3v'], params['t3v'])

    out = out.reshape(N, H, W, C)
    return jnp.transpose(out, (0, 3, 1, 2))                            # back to NCHW


# ----------------------------------------------------------------------------
# Pure-JAX reference (eval-mode BN), NCHW in / NCHW out.
# ----------------------------------------------------------------------------
def pfc_reference(x_nchw, raw):
    x = jnp.transpose(x_nchw, (0, 2, 3, 1)).astype(jnp.float32)
    dn = ('NHWC', 'HWIO', 'NHWC')
    hp = lax.Precision.HIGHEST

    def bn(y, g, b, m, v):
        return (y - m) * g / jnp.sqrt(v + BN_EPS) + b

    y = lax.conv_general_dilated(x, raw['w1_hwio'], (1, 1), [(PAD, PAD)] * 2,
                                 dimension_numbers=dn, precision=hp) + raw['b1']
    y = jnp.maximum(y, 0.0)
    y = bn(y, raw['g1'], raw['be1'], raw['m1'], raw['v1'])
    res = y
    y = lax.conv_general_dilated(y, raw['wd_hwio'], (1, 1), [(PAD, PAD)] * 2,
                                 dimension_numbers=dn,
                                 feature_group_count=raw['C'], precision=hp) + raw['bd']
    y = jnp.maximum(y, 0.0)
    y = bn(y, raw['g2'], raw['be2'], raw['m2'], raw['v2'])
    y = y + res
    y = jnp.einsum('nhwc,cf->nhwf', y, raw['wp_io'], precision=hp) + raw['bp']
    y = jnp.maximum(y, 0.0)
    y = bn(y, raw['g3'], raw['be3'], raw['m3'], raw['v3'])
    return jnp.transpose(y, (0, 3, 1, 2))


# ----------------------------------------------------------------------------
# Deterministic parameter construction (PyTorch layouts -> kernel layouts).
# ----------------------------------------------------------------------------
def make_params(key, cin, c, width):
    ks = jax.random.split(key, 6)

    w1_oihw = 0.1 * jax.random.normal(ks[0], (c, cin, K, K), jnp.float32)
    b1 = 0.05 * jax.random.normal(ks[1], (c,), jnp.float32)
    wd_oihw = 0.1 * jax.random.normal(ks[2], (c, 1, K, K), jnp.float32)
    bd = 0.05 * jax.random.normal(ks[3], (c,), jnp.float32)
    wp_oi11 = 0.2 * jax.random.normal(ks[4], (c, c, 1, 1), jnp.float32)
    bp = 0.05 * jax.random.normal(ks[5], (c,), jnp.float32)

    def bn_params(i):
        ar = jnp.arange(c, dtype=jnp.float32)
        g = 1.0 + 0.10 * jnp.sin(ar + i)
        b = 0.05 * jnp.cos(ar + i)
        m = 0.02 * (ar - i)
        v = 1.0 + 0.03 * ar
        return g, b, m, v

    g1, be1, m1, v1 = bn_params(0)
    g2, be2, m2, v2 = bn_params(1)
    g3, be3, m3, v3 = bn_params(2)

    w1_hwio = jnp.transpose(w1_oihw, (2, 3, 1, 0))   # (K,K,CIN,C)
    wd_hwio = jnp.transpose(wd_oihw, (2, 3, 1, 0))   # (K,K,1,C)
    wp_io = jnp.transpose(wp_oi11[:, :, 0, 0])       # (Cin, Cout)

    raw = dict(C=c, w1_hwio=w1_hwio, wd_hwio=wd_hwio, wp_io=wp_io,
               b1=b1, bd=bd, bp=bp,
               g1=g1, be1=be1, m1=m1, v1=v1,
               g2=g2, be2=be2, m2=m2, v2=v2,
               g3=g3, be3=be3, m3=m3, v3=v3)

    def fold(g, b, m, v):
        s = g / jnp.sqrt(v + BN_EPS)
        return s, b - m * s

    s1, t1 = fold(g1, be1, m1, v1)
    s2, t2 = fold(g2, be2, m2, v2)
    s3, t3 = fold(g3, be3, m3, v3)

    def lane(vc):                                    # (C,) -> (1, W*C); lane = w*C + c
        return jnp.tile(vc, width)[None, :]

    w1b = jnp.stack([_conv_row_band(w1_hwio[kh], width, PAD) for kh in range(K)])
    wdb = jnp.stack([_dw_row_band(wd_hwio[kh, :, 0, :], width, PAD) for kh in range(K)])
    wpb = jnp.kron(jnp.eye(width, dtype=jnp.float32), wp_io)

    params = dict(
        C=c,
        w1b=w1b, b1v=lane(b1), s1v=lane(s1), t1v=lane(t1),
        wdb=wdb, bdv=lane(bd), s2v=lane(s2), t2v=lane(t2),
        wpb=wpb, bpv=lane(bp), s3v=lane(s3), t3v=lane(t3),
    )
    return params, raw


if __name__ == "__main__":
    # W*C = 16*8 = 128 -> exactly lane-dense intermediates and output stores.
    N, CIN, C, H, W = 2, 3, 8, 16, 16
    key = jax.random.PRNGKey(0)
    kx, kp = jax.random.split(key)
    x = jax.random.normal(kx, (N, CIN, H, W), jnp.float32)

    params, raw = make_params(kp, CIN, C, W)

    out = jax.block_until_ready(pfc_forward(x, params))
    ref = jax.block_until_ready(pfc_reference(x, raw))

    assert out.shape == (N, C, H, W), out.shape
    err = float(jnp.max(jnp.abs(out - ref)))
    assert jnp.allclose(out, ref, rtol=2e-4, atol=2e-4), err
    print("KERNEL_OK")
</pallas_src>

<mosaic_0001>
module attributes {stable_mosaic.version = 11 : i64} {
  func.func @pfc_kernel(%arg0: i32, %arg1: memref<1x22x48xf32, #tpu.memory_space<vmem>>, %arg2: memref<7x48x128xf32, #tpu.memory_space<vmem>>, %arg3: memref<1x128xf32, #tpu.memory_space<vmem>>, %arg4: memref<1x128xf32, #tpu.memory_space<vmem>>, %arg5: memref<1x128xf32, #tpu.memory_space<vmem>>, %arg6: memref<7x128x128xf32, #tpu.memory_space<vmem>>, %arg7: memref<1x128xf32, #tpu.memory_space<vmem>>, %arg8: memref<1x128xf32, #tpu.memory_space<vmem>>, %arg9: memref<1x128xf32, #tpu.memory_space<vmem>>, %arg10: memref<128x128xf32, #tpu.memory_space<vmem>>, %arg11: memref<1x128xf32, #tpu.memory_space<vmem>>, %arg12: memref<1x128xf32, #tpu.memory_space<vmem>>, %arg13: memref<1x128xf32, #tpu.memory_space<vmem>>, %arg14: memref<1x16x128xf32, #tpu.memory_space<vmem>>, %arg15: memref<22x128xf32, #tpu.memory_space<vmem>>) attributes {dimension_semantics = [#tpu.dimension_semantics<parallel>], iteration_bounds = array<i64: 2>, scalar_prefetch = 0 : i64, scratch_operands = 1 : i64, tpu.core_type = #tpu.core_type<tc>, window_params = [{transform_indices = @transform_0, window_bounds = array<i64: 1, 22, 48>}, {pipeline_mode = #tpu.pipeline_mode<synchronous>, transform_indices = @transform_1, window_bounds = array<i64: 7, 48, 128>}, {pipeline_mode = #tpu.pipeline_mode<synchronous>, transform_indices = @transform_2, window_bounds = array<i64: 1, 128>}, {pipeline_mode = #tpu.pipeline_mode<synchronous>, transform_indices = @transform_3, window_bounds = array<i64: 1, 128>}, {pipeline_mode = #tpu.pipeline_mode<synchronous>, transform_indices = @transform_4, window_bounds = array<i64: 1, 128>}, {pipeline_mode = #tpu.pipeline_mode<synchronous>, transform_indices = @transform_5, window_bounds = array<i64: 7, 128, 128>}, {pipeline_mode = #tpu.pipeline_mode<synchronous>, transform_indices = @transform_6, window_bounds = array<i64: 1, 128>}, {pipeline_mode = #tpu.pipeline_mode<synchronous>, transform_indices = @transform_7, window_bounds = array<i64: 1, 128>}, {pipeline_mode = #tpu.pipeline_mode<synchronous>, transform_indices = @transform_8, window_bounds = array<i64: 1, 128>}, {pipeline_mode = #tpu.pipeline_mode<synchronous>, transform_indices = @transform_9, window_bounds = array<i64: 128, 128>}, {pipeline_mode = #tpu.pipeline_mode<synchronous>, transform_indices = @transform_10, window_bounds = array<i64: 1, 128>}, {pipeline_mode = #tpu.pipeline_mode<synchronous>, transform_indices = @transform_11, window_bounds = array<i64: 1, 128>}, {pipeline_mode = #tpu.pipeline_mode<synchronous>, transform_indices = @transform_12, window_bounds = array<i64: 1, 128>}, {transform_indices = @transform_13, window_bounds = array<i64: 1, 16, 128>}]} {
    %cst = arith.constant 0.000000e+00 : f32
    %0 = vector.broadcast %cst : f32 to vector<16x128xf32>
    %c0 = arith.constant 0 : index
    %c0_0 = arith.constant 0 : index
    %c0_1 = arith.constant 0 : index
    %1 = vector.load %arg1[%c0, %c0_0, %c0_1] : memref<1x22x48xf32, #tpu.memory_space<vmem>>, vector<1x16x48xf32>
    %2 = vector.shape_cast %1 : vector<1x16x48xf32> to vector<16x48xf32>
    %c0_2 = arith.constant 0 : index
    %c0_3 = arith.constant 0 : index
    %c0_4 = arith.constant 0 : index
    %3 = vector.load %arg2[%c0_2, %c0_3, %c0_4] : memref<7x48x128xf32, #tpu.memory_space<vmem>>, vector<1x48x128xf32>
    %4 = vector.shape_cast %3 : vector<1x48x128xf32> to vector<48x128xf32>
    %cst_5 = arith.constant dense<0.000000e+00> : vector<16x128xf32>
    %5 = tpu.matmul %2, %4, %cst_5 {dimension_numbers = #tpu.dot_dimension_numbers<[1], [0], [0], [1], [0, 0, 1, 1], [], []>} : vector<16x48xf32>, vector<48x128xf32>, vector<16x128xf32> -> vector<16x128xf32>
    %6 = arith.addf %0, %5 : vector<16x128xf32>
    %c0_6 = arith.constant 0 : index
    %c1 = arith.constant 1 : index
    %c0_7 = arith.constant 0 : index
    %7 = vector.load %arg1[%c0_6, %c1, %c0_7] : memref<1x22x48xf32, #tpu.memory_space<vmem>>, vector<1x16x48xf32>
    %8 = vector.shape_cast %7 : vector<1x16x48xf32> to vector<16x48xf32>
    %c1_8 = arith.constant 1 : index
    %c0_9 = arith.constant 0 : index
    %c0_10 = arith.constant 0 : index
    %9 = vector.load %arg2[%c1_8, %c0_9, %c0_10] : memref<7x48x128xf32, #tpu.memory_space<vmem>>, vector<1x48x128xf32>
    %10 = vector.shape_cast %9 : vector<1x48x128xf32> to vector<48x128xf32>
    %cst_11 = arith.constant dense<0.000000e+00> : vector<16x128xf32>
    %11 = tpu.matmul %8, %10, %cst_11 {dimension_numbers = #tpu.dot_dimension_numbers<[1], [0], [0], [1], [0, 0, 1, 1], [], []>} : vector<16x48xf32>, vector<48x128xf32>, vector<16x128xf32> -> vector<16x128xf32>
    %12 = arith.addf %6, %11 : vector<16x128xf32>
    %c0_12 = arith.constant 0 : index
    %c2 = arith.constant 2 : index
    %c0_13 = arith.constant 0 : index
    %13 = vector.load %arg1[%c0_12, %c2, %c0_13] : memref<1x22x48xf32, #tpu.memory_space<vmem>>, vector<1x16x48xf32>
    %14 = vector.shape_cast %13 : vector<1x16x48xf32> to vector<16x48xf32>
    %c2_14 = arith.constant 2 : index
    %c0_15 = arith.constant 0 : index
    %c0_16 = arith.constant 0 : index
    %15 = vector.load %arg2[%c2_14, %c0_15, %c0_16] : memref<7x48x128xf32, #tpu.memory_space<vmem>>, vector<1x48x128xf32>
    %16 = vector.shape_cast %15 : vector<1x48x128xf32> to vector<48x128xf32>
    %cst_17 = arith.constant dense<0.000000e+00> : vector<16x128xf32>
    %17 = tpu.matmul %14, %16, %cst_17 {dimension_numbers = #tpu.dot_dimension_numbers<[1], [0], [0], [1], [0, 0, 1, 1], [], []>} : vector<16x48xf32>, vector<48x128xf32>, vector<16x128xf32> -> vector<16x128xf32>
    %18 = arith.addf %12, %17 : vector<16x128xf32>
    %c0_18 = arith.constant 0 : index
    %c3 = arith.constant 3 : index
    %c0_19 = arith.constant 0 : index
    %19 = vector.load %arg1[%c0_18, %c3, %c0_19] : memref<1x22x48xf32, #tpu.memory_space<vmem>>, vector<1x16x48xf32>
    %20 = vector.shape_cast %19 : vector<1x16x48xf32> to vector<16x48xf32>
    %c3_20 = arith.constant 3 : index
    %c0_21 = arith.constant 0 : index
    %c0_22 = arith.constant 0 : index
    %21 = vector.load %arg2[%c3_20, %c0_21, %c0_22] : memref<7x48x128xf32, #tpu.memory_space<vmem>>, vector<1x48x128xf32>
    %22 = vector.shape_cast %21 : vector<1x48x128xf32> to vector<48x128xf32>
    %cst_23 = arith.constant dense<0.000000e+00> : vector<16x128xf32>
    %23 = tpu.matmul %20, %22, %cst_23 {dimension_numbers = #tpu.dot_dimension_numbers<[1], [0], [0], [1], [0, 0, 1, 1], [], []>} : vector<16x48xf32>, vector<48x128xf32>, vector<16x128xf32> -> vector<16x128xf32>
    %24 = arith.addf %18, %23 : vector<16x128xf32>
    %c0_24 = arith.constant 0 : index
    %c4 = arith.constant 4 : index
    %c0_25 = arith.constant 0 : index
    %25 = vector.load %arg1[%c0_24, %c4, %c0_25] : memref<1x22x48xf32, #tpu.memory_space<vmem>>, vector<1x16x48xf32>
    %26 = vector.shape_cast %25 : vector<1x16x48xf32> to vector<16x48xf32>
    %c4_26 = arith.constant 4 : index
    %c0_27 = arith.constant 0 : index
    %c0_28 = arith.constant 0 : index
    %27 = vector.load %arg2[%c4_26, %c0_27, %c0_28] : memref<7x48x128xf32, #tpu.memory_space<vmem>>, vector<1x48x128xf32>
    %28 = vector.shape_cast %27 : vector<1x48x128xf32> to vector<48x128xf32>
    %cst_29 = arith.constant dense<0.000000e+00> : vector<16x128xf32>
    %29 = tpu.matmul %26, %28, %cst_29 {dimension_numbers = #tpu.dot_dimension_numbers<[1], [0], [0], [1], [0, 0, 1, 1], [], []>} : vector<16x48xf32>, vector<48x128xf32>, vector<16x128xf32> -> vector<16x128xf32>
    %30 = arith.addf %24, %29 : vector<16x128xf32>
    %c0_30 = arith.constant 0 : index
    %c5 = arith.constant 5 : index
    %c0_31 = arith.constant 0 : index
    %31 = vector.load %arg1[%c0_30, %c5, %c0_31] : memref<1x22x48xf32, #tpu.memory_space<vmem>>, vector<1x16x48xf32>
    %32 = vector.shape_cast %31 : vector<1x16x48xf32> to vector<16x48xf32>
    %c5_32 = arith.constant 5 : index
    %c0_33 = arith.constant 0 : index
    %c0_34 = arith.constant 0 : index
    %33 = vector.load %arg2[%c5_32, %c0_33, %c0_34] : memref<7x48x128xf32, #tpu.memory_space<vmem>>, vector<1x48x128xf32>
    %34 = vector.shape_cast %33 : vector<1x48x128xf32> to vector<48x128xf32>
    %cst_35 = arith.constant dense<0.000000e+00> : vector<16x128xf32>
    %35 = tpu.matmul %32, %34, %cst_35 {dimension_numbers = #tpu.dot_dimension_numbers<[1], [0], [0], [1], [0, 0, 1, 1], [], []>} : vector<16x48xf32>, vector<48x128xf32>, vector<16x128xf32> -> vector<16x128xf32>
    %36 = arith.addf %30, %35 : vector<16x128xf32>
    %c0_36 = arith.constant 0 : index
    %c6 = arith.constant 6 : index
    %c0_37 = arith.constant 0 : index
    %37 = vector.load %arg1[%c0_36, %c6, %c0_37] : memref<1x22x48xf32, #tpu.memory_space<vmem>>, vector<1x16x48xf32>
    %38 = vector.shape_cast %37 : vector<1x16x48xf32> to vector<16x48xf32>
    %c6_38 = arith.constant 6 : index
    %c0_39 = arith.constant 0 : index
    %c0_40 = arith.constant 0 : index
    %39 = vector.load %arg2[%c6_38, %c0_39, %c0_40] : memref<7x48x128xf32, #tpu.memory_space<vmem>>, vector<1x48x128xf32>
    %40 = vector.shape_cast %39 : vector<1x48x128xf32> to vector<48x128xf32>
    %cst_41 = arith.constant dense<0.000000e+00> : vector<16x128xf32>
    %41 = tpu.matmul %38, %40, %cst_41 {dimension_numbers = #tpu.dot_dimension_numbers<[1], [0], [0], [1], [0, 0, 1, 1], [], []>} : vector<16x48xf32>, vector<48x128xf32>, vector<16x128xf32> -> vector<16x128xf32>
    %42 = arith.addf %36, %41 : vector<16x128xf32>
    %c0_42 = arith.constant 0 : index
    %c0_43 = arith.constant 0 : index
    %43 = vector.load %arg3[%c0_42, %c0_43] : memref<1x128xf32, #tpu.memory_space<vmem>>, vector<1x128xf32>
    %44 = vector.broadcast %43 : vector<1x128xf32> to vector<16x128xf32>
    %45 = arith.addf %42, %44 : vector<16x128xf32>
    %cst_44 = arith.constant 0.000000e+00 : f32
    %46 = vector.broadcast %cst_44 : f32 to vector<16x128xf32>
    %47 = arith.maximumf %45, %46 : vector<16x128xf32>
    %c0_45 = arith.constant 0 : index
    %c0_46 = arith.constant 0 : index
    %48 = vector.load %arg4[%c0_45, %c0_46] : memref<1x128xf32, #tpu.memory_space<vmem>>, vector<1x128xf32>
    %49 = vector.broadcast %48 : vector<1x128xf32> to vector<16x128xf32>
    %50 = arith.mulf %47, %49 : vector<16x128xf32>
    %c0_47 = arith.constant 0 : index
    %c0_48 = arith.constant 0 : index
    %51 = vector.load %arg5[%c0_47, %c0_48] : memref<1x128xf32, #tpu.memory_space<vmem>>, vector<1x128xf32>
    %52 = vector.broadcast %51 : vector<1x128xf32> to vector<16x128xf32>
    %53 = arith.addf %50, %52 : vector<16x128xf32>
    %cst_49 = arith.constant 0.000000e+00 : f32
    %54 = vector.broadcast %cst_49 : f32 to vector<3x128xf32>
    %c0_50 = arith.constant 0 : index
    %c0_51 = arith.constant 0 : index
    %55 = vector.load %arg15[%c0_50, %c0_51] : memref<22x128xf32, #tpu.memory_space<vmem>>, vector<3x128xf32>
    tpu.vector_store %arg15[%c0_50, %c0_51], %54 {strides = array<i32>} : memref<22x128xf32, #tpu.memory_space<vmem>>, vector<3x128xf32>,
    %cst_52 = arith.constant 0.000000e+00 : f32
    %56 = vector.broadcast %cst_52 : f32 to vector<3x128xf32>
    %c19 = arith.constant 19 : index
    %c0_53 = arith.constant 0 : index
    %57 = vector.load %arg15[%c19, %c0_53] : memref<22x128xf32, #tpu.memory_space<vmem>>, vector<3x128xf32>
    tpu.vector_store %arg15[%c19, %c0_53], %56 {strides = array<i32>} : memref<22x128xf32, #tpu.memory_space<vmem>>, vector<3x128xf32>,
    %c3_54 = arith.constant 3 : index
    %c0_55 = arith.constant 0 : index
    %58 = vector.load %arg15[%c3_54, %c0_55] : memref<22x128xf32, #tpu.memory_space<vmem>>, vector<16x128xf32>
    tpu.vector_store %arg15[%c3_54, %c0_55], %53 {strides = array<i32>} : memref<22x128xf32, #tpu.memory_space<vmem>>, vector<16x128xf32>,
    %cst_56 = arith.constant 0.000000e+00 : f32
    %59 = vector.broadcast %cst_56 : f32 to vector<16x128xf32>
    %c0_57 = arith.constant 0 : index
    %c0_58 = arith.constant 0 : index
    %60 = vector.load %arg15[%c0_57, %c0_58] : memref<22x128xf32, #tpu.memory_space<vmem>>, vector<16x128xf32>
    %c0_59 = arith.constant 0 : index
    %c0_60 = arith.constant 0 : index
    %c0_61 = arith.constant 0 : index
    %61 = vector.load %arg6[%c0_59, %c0_60, %c0_61] : memref<7x128x128xf32, #tpu.memory_space<vmem>>, vector<1x128x128xf32>
    %62 = vector.shape_cast %61 : vector<1x128x128xf32> to vector<128x128xf32>
    %cst_62 = arith.constant dense<0.000000e+00> : vector<16x128xf32>
    %63 = tpu.matmul %60, %62, %cst_62 {dimension_numbers = #tpu.dot_dimension_numbers<[1], [0], [0], [1], [0, 0, 1, 1], [], []>} : vector<16x128xf32>, vector<128x128xf32>, vector<16x128xf32> -> vector<16x128xf32>
    %64 = arith.addf %59, %63 : vector<16x128xf32>
    %c1_63 = arith.constant 1 : index
    %c0_64 = arith.constant 0 : index
    %65 = vector.load %arg15[%c1_63, %c0_64] : memref<22x128xf32, #tpu.memory_space<vmem>>, vector<16x128xf32>
    %c1_65 = arith.constant 1 : index
    %c0_66 = arith.constant 0 : index
    %c0_67 = arith.constant 0 : index
    %66 = vector.load %arg6[%c1_65, %c0_66, %c0_67] : memref<7x128x128xf32, #tpu.memory_space<vmem>>, vector<1x128x128xf32>
    %67 = vector.shape_cast %66 : vector<1x128x128xf32> to vector<128x128xf32>
    %cst_68 = arith.constant dense<0.000000e+00> : vector<16x128xf32>
    %68 = tpu.matmul %65, %67, %cst_68 {dimension_numbers = #tpu.dot_dimension_numbers<[1], [0], [0], [1], [0, 0, 1, 1], [], []>} : vector<16x128xf32>, vector<128x128xf32>, vector<16x128xf32> -> vector<16x128xf32>
    %69 = arith.addf %64, %68 : vector<16x128xf32>
    %c2_69 = arith.constant 2 : index
    %c0_70 = arith.constant 0 : index
    %70 = vector.load %arg15[%c2_69, %c0_70] : memref<22x128xf32, #tpu.memory_space<vmem>>, vector<16x128xf32>
    %c2_71 = arith.constant 2 : index
    %c0_72 = arith.constant 0 : index
    %c0_73 = arith.constant 0 : index
    %71 = vector.load %arg6[%c2_71, %c0_72, %c0_73] : memref<7x128x128xf32, #tpu.memory_space<vmem>>, vector<1x128x128xf32>
    %72 = vector.shape_cast %71 : vector<1x128x128xf32> to vector<128x128xf32>
    %cst_74 = arith.constant dense<0.000000e+00> : vector<16x128xf32>
    %73 = tpu.matmul %70, %72, %cst_74 {dimension_numbers = #tpu.dot_dimension_numbers<[1], [0], [0], [1], [0, 0, 1, 1], [], []>} : vector<16x128xf32>, vector<128x128xf32>, vector<16x128xf32> -> vector<16x128xf32>
    %74 = arith.addf %69, %73 : vector<16x128xf32>
    %c3_75 = arith.constant 3 : index
    %c0_76 = arith.constant 0 : index
    %75 = vector.load %arg15[%c3_75, %c0_76] : memref<22x128xf32, #tpu.memory_space<vmem>>, vector<16x128xf32>
    %c3_77 = arith.constant 3 : index
    %c0_78 = arith.constant 0 : index
    %c0_79 = arith.constant 0 : index
    %76 = vector.load %arg6[%c3_77, %c0_78, %c0_79] : memref<7x128x128xf32, #tpu.memory_space<vmem>>, vector<1x128x128xf32>
    %77 = vector.shape_cast %76 : vector<1x128x128xf32> to vector<128x128xf32>
    %cst_80 = arith.constant dense<0.000000e+00> : vector<16x128xf32>
    %78 = tpu.matmul %75, %77, %cst_80 {dimension_numbers = #tpu.dot_dimension_numbers<[1], [0], [0], [1], [0, 0, 1, 1], [], []>} : vector<16x128xf32>, vector<128x128xf32>, vector<16x128xf32> -> vector<16x128xf32>
    %79 = arith.addf %74, %78 : vector<16x128xf32>
    %c4_81 = arith.constant 4 : index
    %c0_82 = arith.constant 0 : index
    %80 = vector.load %arg15[%c4_81, %c0_82] : memref<22x128xf32, #tpu.memory_space<vmem>>, vector<16x128xf32>
    %c4_83 = arith.constant 4 : index
    %c0_84 = arith.constant 0 : index
    %c0_85 = arith.constant 0 : index
    %81 = vector.load %arg6[%c4_83, %c0_84, %c0_85] : memref<7x128x128xf32, #tpu.memory_space<vmem>>, vector<1x128x128xf32>
    %82 = vector.shape_cast %81 : vector<1x128x128xf32> to vector<128x128xf32>
    %cst_86 = arith.constant dense<0.000000e+00> : vector<16x128xf32>
    %83 = tpu.matmul %80, %82, %cst_86 {dimension_numbers = #tpu.dot_dimension_numbers<[1], [0], [0], [1], [0, 0, 1, 1], [], []>} : vector<16x128xf32>, vector<128x128xf32>, vector<16x128xf32> -> vector<16x128xf32>
    %84 = arith.addf %79, %83 : vector<16x128xf32>
    %c5_87 = arith.constant 5 : index
    %c0_88 = arith.constant 0 : index
    %85 = vector.load %arg15[%c5_87, %c0_88] : memref<22x128xf32, #tpu.memory_space<vmem>>, vector<16x128xf32>
    %c5_89 = arith.constant 5 : index
    %c0_90 = arith.constant 0 : index
    %c0_91 = arith.constant 0 : index
    %86 = vector.load %arg6[%c5_89, %c0_90, %c0_91] : memref<7x128x128xf32, #tpu.memory_space<vmem>>, vector<1x128x128xf32>
    %87 = vector.shape_cast %86 : vector<1x128x128xf32> to vector<128x128xf32>
    %cst_92 = arith.constant dense<0.000000e+00> : vector<16x128xf32>
    %88 = tpu.matmul %85, %87, %cst_92 {dimension_numbers = #tpu.dot_dimension_numbers<[1], [0], [0], [1], [0, 0, 1, 1], [], []>} : vector<16x128xf32>, vector<128x128xf32>, vector<16x128xf32> -> vector<16x128xf32>
    %89 = arith.addf %84, %88 : vector<16x128xf32>
    %c6_93 = arith.constant 6 : index
    %c0_94 = arith.constant 0 : index
    %90 = vector.load %arg15[%c6_93, %c0_94] : memref<22x128xf32, #tpu.memory_space<vmem>>, vector<16x128xf32>
    %c6_95 = arith.constant 6 : index
    %c0_96 = arith.constant 0 : index
    %c0_97 = arith.constant 0 : index
    %91 = vector.load %arg6[%c6_95, %c0_96, %c0_97] : memref<7x128x128xf32, #tpu.memory_space<vmem>>, vector<1x128x128xf32>
    %92 = vector.shape_cast %91 : vector<1x128x128xf32> to vector<128x128xf32>
    %cst_98 = arith.constant dense<0.000000e+00> : vector<16x128xf32>
    %93 = tpu.matmul %90, %92, %cst_98 {dimension_numbers = #tpu.dot_dimension_numbers<[1], [0], [0], [1], [0, 0, 1, 1], [], []>} : vector<16x128xf32>, vector<128x128xf32>, vector<16x128xf32> -> vector<16x128xf32>
    %94 = arith.addf %89, %93 : vector<16x128xf32>
    %c0_99 = arith.constant 0 : index
    %c0_100 = arith.constant 0 : index
    %95 = vector.load %arg7[%c0_99, %c0_100] : memref<1x128xf32, #tpu.memory_space<vmem>>, vector<1x128xf32>
    %96 = vector.broadcast %95 : vector<1x128xf32> to vector<16x128xf32>
    %97 = arith.addf %94, %96 : vector<16x128xf32>
    %cst_101 = arith.constant 0.000000e+00 : f32
    %98 = vector.broadcast %cst_101 : f32 to vector<16x128xf32>
    %99 = arith.maximumf %97, %98 : vector<16x128xf32>
    %c0_102 = arith.constant 0 : index
    %c0_103 = arith.constant 0 : index
    %100 = vector.load %arg8[%c0_102, %c0_103] : memref<1x128xf32, #tpu.memory_space<vmem>>, vector<1x128xf32>
    %101 = vector.broadcast %100 : vector<1x128xf32> to vector<16x128xf32>
    %102 = arith.mulf %99, %101 : vector<16x128xf32>
    %c0_104 = arith.constant 0 : index
    %c0_105 = arith.constant 0 : index
    %103 = vector.load %arg9[%c0_104, %c0_105] : memref<1x128xf32, #tpu.memory_space<vmem>>, vector<1x128xf32>
    %104 = vector.broadcast %103 : vector<1x128xf32> to vector<16x128xf32>
    %105 = arith.addf %102, %104 : vector<16x128xf32>
    %106 = arith.addf %105, %53 : vector<16x128xf32>
    %c0_106 = arith.constant 0 : index
    %c0_107 = arith.constant 0 : index
    %107 = vector.load %arg10[%c0_106, %c0_107] : memref<128x128xf32, #tpu.memory_space<vmem>>, vector<128x128xf32>
    %cst_108 = arith.constant dense<0.000000e+00> : vector<16x128xf32>
    %108 = tpu.matmul %106, %107, %cst_108 {dimension_numbers = #tpu.dot_dimension_numbers<[1], [0], [0], [1], [0, 0, 1, 1], [], []>} : vector<16x128xf32>, vector<128x128xf32>, vector<16x128xf32> -> vector<16x128xf32>
    %c0_109 = arith.constant 0 : index
    %c0_110 = arith.constant 0 : index
    %109 = vector.load %arg11[%c0_109, %c0_110] : memref<1x128xf32, #tpu.memory_space<vmem>>, vector<1x128xf32>
    %110 = vector.broadcast %109 : vector<1x128xf32> to vector<16x128xf32>
    %111 = arith.addf %108, %110 : vector<16x128xf32>
    %cst_111 = arith.constant 0.000000e+00 : f32
    %112 = vector.broadcast %cst_111 : f32 to vector<16x128xf32>
    %113 = arith.maximumf %111, %112 : vector<16x128xf32>
    %c0_112 = arith.constant 0 : index
    %c0_113 = arith.constant 0 : index
    %114 = vector.load %arg12[%c0_112, %c0_113] : memref<1x128xf32, #tpu.memory_space<vmem>>, vector<1x128xf32>
    %115 = vector.broadcast %114 : vector<1x128xf32> to vector<16x128xf32>
    %116 = arith.mulf %113, %115 : vector<16x128xf32>
    %c0_114 = arith.constant 0 : index
    %c0_115 = arith.constant 0 : index
    %117 = vector.load %arg13[%c0_114, %c0_115] : memref<1x128xf32, #tpu.memory_space<vmem>>, vector<1x128xf32>
    %118 = vector.broadcast %117 : vector<1x128xf32> to vector<16x128xf32>
    %119 = arith.addf %116, %118 : vector<16x128xf32>
    %c0_116 = arith.constant 0 : index
    %c0_117 = arith.constant 0 : index
    %c0_118 = arith.constant 0 : index
    %120 = vector.load %arg14[%c0_116, %c0_117, %c0_118] : memref<1x16x128xf32, #tpu.memory_space<vmem>>, vector<1x16x128xf32>
    %121 = vector.shape_cast %120 : vector<1x16x128xf32> to vector<16x128xf32>
    %122 = vector.shape_cast %119 : vector<16x128xf32> to vector<1x16x128xf32>
    tpu.vector_store %arg14[%c0_116, %c0_117, %c0_118], %122 {strides = array<i32>} : memref<1x16x128xf32, #tpu.memory_space<vmem>>, vector<1x16x128xf32>,
    return
  }
  func.func @transform_0(%arg0: i32) -> (i32, i32, i32) {
    %c0_i32 = arith.constant 0 : i32
    %c0_i32_0 = arith.constant 0 : i32
    %c0_i32_1 = arith.constant 0 : i32
    return %arg0, %c0_i32, %c0_i32_0 : i32, i32, i32
  }
  func.func @transform_1(%arg0: i32) -> (i32, i32, i32) {
    %c0_i32 = arith.constant 0 : i32
    %c0_i32_0 = arith.constant 0 : i32
    %c0_i32_1 = arith.constant 0 : i32
    %c0_i32_2 = arith.constant 0 : i32
    return %c0_i32, %c0_i32_0, %c0_i32_1 : i32, i32, i32
  }
  func.func @transform_2(%arg0: i32) -> (i32, i32) {
    %c0_i32 = arith.constant 0 : i32
    %c0_i32_0 = arith.constant 0 : i32
    %c0_i32_1 = arith.constant 0 : i32
    return %c0_i32, %c0_i32_0 : i32, i32
  }
  func.func @transform_3(%arg0: i32) -> (i32, i32) {
    %c0_i32 = arith.constant 0 : i32
    %c0_i32_0 = arith.constant 0 : i32
    %c0_i32_1 = arith.constant 0 : i32
    return %c0_i32, %c0_i32_0 : i32, i32
  }
  func.func @transform_4(%arg0: i32) -> (i32, i32) {
    %c0_i32 = arith.constant 0 : i32
    %c0_i32_0 = arith.constant 0 : i32
    %c0_i32_1 = arith.constant 0 : i32
    return %c0_i32, %c0_i32_0 : i32, i32
  }
  func.func @transform_5(%arg0: i32) -> (i32, i32, i32) {
    %c0_i32 = arith.constant 0 : i32
    %c0_i32_0 = arith.constant 0 : i32
    %c0_i32_1 = arith.constant 0 : i32
    %c0_i32_2 = arith.constant 0 : i32
    return %c0_i32, %c0_i32_0, %c0_i32_1 : i32, i32, i32
  }
  func.func @transform_6(%arg0: i32) -> (i32, i32) {
    %c0_i32 = arith.constant 0 : i32
    %c0_i32_0 = arith.constant 0 : i32
    %c0_i32_1 = arith.constant 0 : i32
    return %c0_i32, %c0_i32_0 : i32, i32
  }
  func.func @transform_7(%arg0: i32) -> (i32, i32) {
    %c0_i32 = arith.constant 0 : i32
    %c0_i32_0 = arith.constant 0 : i32
    %c0_i32_1 = arith.constant 0 : i32
    return %c0_i32, %c0_i32_0 : i32, i32
  }
  func.func @transform_8(%arg0: i32) -> (i32, i32) {
    %c0_i32 = arith.constant 0 : i32
    %c0_i32_0 = arith.constant 0 : i32
    %c0_i32_1 = arith.constant 0 : i32
    return %c0_i32, %c0_i32_0 : i32, i32
  }
  func.func @transform_9(%arg0: i32) -> (i32, i32) {
    %c0_i32 = arith.constant 0 : i32
    %c0_i32_0 = arith.constant 0 : i32
    %c0_i32_1 = arith.constant 0 : i32
    return %c0_i32, %c0_i32_0 : i32, i32
  }
  func.func @transform_10(%arg0: i32) -> (i32, i32) {
    %c0_i32 = arith.constant 0 : i32
    %c0_i32_0 = arith.constant 0 : i32
    %c0_i32_1 = arith.constant 0 : i32
    return %c0_i32, %c0_i32_0 : i32, i32
  }
  func.func @transform_11(%arg0: i32) -> (i32, i32) {
    %c0_i32 = arith.constant 0 : i32
    %c0_i32_0 = arith.constant 0 : i32
    %c0_i32_1 = arith.constant 0 : i32
    return %c0_i32, %c0_i32_0 : i32, i32
  }
  func.func @transform_12(%arg0: i32) -> (i32, i32) {
    %c0_i32 = arith.constant 0 : i32
    %c0_i32_0 = arith.constant 0 : i32
    %c0_i32_1 = arith.constant 0 : i32
    return %c0_i32, %c0_i32_0 : i32, i32
  }
  func.func @transform_13(%arg0: i32) -> (i32, i32, i32) {
    %c0_i32 = arith.constant 0 : i32
    %c0_i32_0 = arith.constant 0 : i32
    %c0_i32_1 = arith.constant 0 : i32
    return %arg0, %c0_i32, %c0_i32_0 : i32, i32, i32
  }
}

</mosaic_0001>

<bundles_post_ra>
// kernel: tpu_custom_call.1
= control target key start
LH: loop header
LB: loop body
LE: loop exit
PB: predicated region body
PF: predicated region fallthrough
CT: control target
= control target key end

     0   :  { %s3661_s0 = inlined_call_operand.vmem [shape: f32[2,22,48], index: 0, kind: input, shape index: {}]   ;;  %s3662_s1 = inlined_call_operand.hbm [shape: f32[7,48,128], index: 1, kind: input, shape index: {}]   ;;  %s3663_s2 = inlined_call_operand.vmem [shape: f32[1,128], index: 2, kind: input, shape index: {}]   ;;  %s3664_s3 = inlined_call_operand.vmem [shape: f32[1,128], index: 3, kind: input, shape index: {}]   ;;  %s3665_s4 = inlined_call_operand.vmem [shape: f32[1,128], index: 4, kind: input, shape index: {}]   ;;  %s3666_s5 = inlined_call_operand.hbm [shape: f32[7,128,128], index: 5, kind: input, shape index: {}]   ;;  %s3667_s6 = inlined_call_operand.vmem [shape: f32[1,128], index: 6, kind: input, shape index: {}]   ;;  %s3668_s7 = inlined_call_operand.vmem [shape: f32[1,128], index: 7, kind: input, shape index: {}]   ;;  %s3669_s8 = inlined_call_operand.vmem [shape: f32[1,128], index: 8, kind: input, shape index: {}]   ;;  %s3670_s9 = inlined_call_operand.hbm [shape: f32[128,128], index: 9, kind: input, shape index: {}]   ;;  %s3671_s10 = inlined_call_operand.vmem [shape: f32[1,128], index: 10, kind: input, shape index: {}]   ;;  %s3672_s11 = inlined_call_operand.vmem [shape: f32[1,128], index: 11, kind: input, shape index: {}]   ;;  %s3673_s12 = inlined_call_operand.vmem [shape: f32[1,128], index: 12, kind: input, shape index: {}]   ;;  %s3674_s13 = inlined_call_operand.hbm [shape: f32[2,16,128], index: 13, kind: output, shape index: {}]  }
   0x1   :  { %3687 = sst [smem:[#allocation20_spill]] %s3673_s12 }
   0x2   :  { %3688 = sst [smem:[#allocation21_spill]] %s3674_s13 }
   0x3   :  { %18 = vsyncpa [#allocation4], 0 }
   0x4   :  { %19 = vsyncpa [#allocation7], 0 }
   0x5   :  { %20 = vsyncpa [#allocation5], 0 }
   0x6   :  { %22 = vsyncpa [#allocation5 + $0x1], 0  ;;  %s3382_s25 = smov 0   ;;  %s3384_s26 = smov 0  }
   0x7   :  { %s3386_s27 = smov 0   ;;  %s3388_s28 = smov 0  }
   0x8 LB: > { %3689 = sst [smem:[#allocation13_spill]] %s3289_s25  ;;  %s3403_s29 = sadd.s32 4294967295, %s3301_s28   ;;  %s3301_s28 = sphi %s3388_s28, %s3714_s28   ;;  %s3297_s27 = sphi %s3386_s27, %s3716_s27   ;;  %s3293_s26 = sphi %s3384_s26, %s3718_s26   ;;  %s3289_s25 = sphi %s3382_s25, %s3717_s25  }
   0x9   : > { %3690 = sst [smem:[#allocation14_spill]] %s3297_s27  ;;  %s2081_s30 = sadd.s32 4294967294, %s3301_s28  }
   0xa   : > { %3691 = sst [smem:[#allocation15_spill]] %s3301_s28  ;;  %s3407_s14 = sadd.s32 1, %s3301_s28  }
   0xb   : > { %3692 = sst [smem:[#allocation16_spill]] %s3407_s14  ;;  %s313_s15 = sadd.s32 1, %s3297_s27 }
   0xc   : > { %s310_s16 = ssub.s32 %s3301_s28, %s3407_s14  ;;  %p323_p0 = scmp.ne.s32.totalorder %s3297_s27, %s3293_s26 }
   0xd   : > { %p311_p1 = scmp.eq.s32.totalorder %s310_s16, 0  ;;  %p324_p2 = scmp.eq.s32.totalorder %s3403_s29, 1 }
   0xe   : > { %p329_p3 = scmp.ne.s32.totalorder %s3293_s26, %s3289_s25  ;;  %p330_p4 = scmp.eq.s32.totalorder %s2081_s30, 1 }
   0xf   : > { %s3418_s17 = scalar_select %p311_p1, %s3297_s27, %s313_s15  }
  0x10   : > { %p3420_p5 = por %p324_p2, %p323_p0  ;;  %p3424_p6 = por %p330_p4, %p329_p3 }
  0x11   : > { %3693 = sst [smem:[#allocation17_spill]] %s3418_s17  ;;  %p2082_p7 = scmp.ge.s32.totalorder %s3301_s28, 1 }
  0x12   : > { %s3694_s18 = scalar_select %p3420_p5, 1, 0 }
  0x13   : > { %s3696_s19 = scalar_select %p3424_p6, 1, 0 }
  0x14   : > { %3695 = sst [smem:[#allocation18_spill]] %s3694_s18  ;;  %p337_p8 = scmp.lt.s32.totalorder %s3301_s28, 3 }
  0x15   : > { %3697 = sst [smem:[#allocation19_spill]] %s3696_s19  ;;  %p3680_p9 = scmp.eq.s32.totalorder %s3403_s29, 0 }
  0x16   : > { %p3431_p10 = pnand %p2082_p7, %p337_p8  ;;  %s3303_s21 = smov [#allocation6]  }
  0x17   : > { %s371_s22 = sshll.u32 %s3303_s21, 4  ;;  %s3304_s24 = smov [#allocation3]   ;;  %s3437_s22 = int_to_ptr.vmem [resolvable:$true] %s371_s22 }
  0x18   : > { %s3698_s20 = scalar_select %p3431_p10, 1, 0 }
  0x19   : > { %p3086_p11 = pneg %p3431_p10  ;;  %s349_s30 = sshll.u32 %s3304_s24, 4  ;;  %s3445_s30 = int_to_ptr.vmem [resolvable:$true] %s349_s30 }
  0x1a   : > { %s3305_s15 = smov [#allocation8]   ;;  %s3147_s14 = scalar_lea.hbm %s3666_s5, 14336 }
  0x1b   : > { %p3441_p12 = pnand %p3680_p9, %p3086_p11  ;;  %s3447_s16 = sshll.u32 %s3305_s15, 4  ;;  %s394_s16 = int_to_ptr.vmem [resolvable:$true] %s3447_s16 }
  0x1c   : > { %p3148_p13 = scmp.ne.s32.totalorder %s3666_s5, %s3147_s14  ;;  %p3154_p3 = scmp.lt.u32.totalorder %s3147_s14, %s3666_s5 }
  0x1d   : > { %p3457_p0 = pneg %p3441_p12 }
  0x1f   : > { %p3150_p1 = pnand %p3457_p0, %p3148_p13 }
  0x21   : > { %p3151_p2 = pneg %p3150_p1 }
  0x23   : > { %p3156_p4 = pnand %p3154_p3, %p3151_p2 }
  0x25   : > { %3159 = shalt.err (!%p3156_p4)
}
  0x26   : > { %s3160_s27 = scalar_lea.vmem %s3437_s22, 14336  ;;  %p3168_p9 = scmp.lt.s32.totalorder %s3437_s22, %s3437_s22 }
  0x27   : > { %p3161_p7 = scmp.ne.s32.totalorder %s3437_s22, %s3160_s27  ;;  %p3169_p6 = scmp.lt.s32.totalorder %s3160_s27, %s3160_s27 }
  0x29   : > { %p3163_p8 = pnand %p3161_p7, %p3457_p0  ;;  %p3170_p13 = por %p3169_p6, %p3168_p9 }
  0x2b   : > { %p3164_p11 = pneg %p3163_p8 }
  0x2d   : > { %p3171_p1 = pnand %p3170_p13, %p3164_p11 }
  0x2f   : > { %3174 = shalt.err (!%p3171_p1)
}
  0x30   : > { %s3306_s17 = smov 128   ;;  %s3307_s14 = smov 8  }
  0x31   : > { %3092 = dma.hbm_to_vmem [thread:$0]  (!%p3441_p12), %s3666_s5, 14336, %s3437_s22, [#allocation7], %s3306_s17, %s3306_s17, %s3307_s14  }
  0x32   : > { %s3175_s27 = scalar_lea.hbm %s3662_s1, 5376 }
  0x33   : > { %p3176_p6 = scmp.ne.s32.totalorder %s3662_s1, %s3175_s27  ;;  %p3182_p3 = scmp.lt.u32.totalorder %s3175_s27, %s3662_s1 }
  0x35   : > { %p3178_p9 = pnand %p3176_p6, %p3457_p0 }
  0x37   : > { %p3179_p2 = pneg %p3178_p9 }
  0x39   : > { %p3184_p4 = pnand %p3182_p3, %p3179_p2 }
  0x3b   : > { %3187 = shalt.err (!%p3184_p4)
}
  0x3c   : > { %s3188_s22 = scalar_lea.vmem %s3445_s30, 5376  ;;  %p3196_p13 = scmp.lt.s32.totalorder %s3445_s30, %s3445_s30 }
  0x3d   : > { %p3189_p7 = scmp.ne.s32.totalorder %s3445_s30, %s3188_s22  ;;  %p3197_p1 = scmp.lt.s32.totalorder %s3188_s22, %s3188_s22 }
  0x3f   : > { %p3191_p8 = pnand %p3189_p7, %p3457_p0  ;;  %p3198_p6 = por %p3197_p1, %p3196_p13 }
  0x41   : > { %p3192_p11 = pneg %p3191_p8 }
  0x43   : > { %p3199_p9 = pnand %p3198_p6, %p3192_p11 }
  0x45   : > { %3202 = shalt.err (!%p3199_p9)
}
  0x46   : > { %3089 = dma.hbm_to_vmem [thread:$0]  (!%p3441_p12), %s3662_s1, 5376, %s3445_s30, [#allocation4], %s3306_s17, %s3306_s17, %s3307_s14  }
  0x47   : > { %s3203_s19 = scalar_lea.hbm %s3670_s9, 2048 }
  0x48   : > { %p3204_p2 = scmp.ne.s32.totalorder %s3670_s9, %s3203_s19  ;;  %p3210_p7 = scmp.lt.u32.totalorder %s3203_s19, %s3670_s9 }
  0x4a   : > { %p3206_p3 = pnand %p3204_p2, %p3457_p0 }
  0x4c   : > { %p3207_p4 = pneg %p3206_p3 }
  0x4e   : > { %p3212_p8 = pnand %p3210_p7, %p3207_p4 }
  0x50   : > { %3215 = shalt.err (!%p3212_p8)
}
  0x51   : > { %s3216_s22 = scalar_lea.vmem %s394_s16, 2048  ;;  %p3224_p6 = scmp.lt.s32.totalorder %s394_s16, %s394_s16 }
  0x52   : > { %p3217_p11 = scmp.ne.s32.totalorder %s394_s16, %s3216_s22  ;;  %p3225_p9 = scmp.lt.s32.totalorder %s3216_s22, %s3216_s22 }
  0x54   : > { %p3219_p13 = pnand %p3217_p11, %p3457_p0  ;;  %p3226_p5 = por %p3225_p9, %p3224_p6 }
  0x56   : > { %p3220_p1 = pneg %p3219_p13 }
  0x58   : > { %p3227_p10 = pnand %p3226_p5, %p3220_p1 }
  0x5a   : > { %3230 = shalt.err (!%p3227_p10)
}
  0x5b   : > { %3095 = dma.hbm_to_vmem [thread:$0]  (!%p3441_p12), %s3670_s9, 2048, %s394_s16, [#allocation7], %s3306_s17, %s3306_s17, %s3307_s14  }
  0x5c   : > { %p3701_p2 = scmp.ne.s32.totalorder %s3698_s20, 0 }
  0x5d   : > { %p3702_p0 = scmp.eq.s32.totalorder (!%p3701_p2), %s3403_s29, 0 }
  0x5e   : > { %426 = sbr.rel (%p3701_p2) target bundleno = 1003 (0x3eb), region = 72 }
  0x65   : > { %3276 = dma.done.wait (%p3702_p0), [#allocation4], 5376   ;;  %p3703_p3 = pmov %p3702_p0 }
  0x66   : > { %p3704_p5 = pmov %p3702_p0 }
  0x67   : > { %3278 = vsyncadd (%p3703_p3), [#allocation4], 4294961920 }
  0x68   : > { %3280 = dma.done.wait (%p3704_p5), [#allocation7], 16384   ;;  %p3705_p10 = pmov %p3702_p0 }
  0x69   : > { %p478_p4 = scmp.lt.s32.totalorder %s3403_s29, 1  ;;  %v485_v0 = vld [vmem:[#allocation3] sm:$0xff]  ;;  %v486_v1 = vld [vmem:[#allocation3 + $0x8] sm:$0xff]  ;;  %v487_v2 = vld [vmem:[#allocation3 + $0x10] sm:$0xff]  ;;  %vm500_vm0 = vcmask 392192   ;;  %s3706_s18 = sld [smem:[#allocation20_spill]] }
  0x6a   : > { %3282 = vsyncadd (%p3705_p10), [#allocation7], 4294950912  ;;  %v2719_v3 = vpack.c.bf16 %v486_v1, %v485_v0  ;;  %v488_v4 = vld [vmem:[#allocation3 + $0x18] sm:$0xff]  ;;  %v489_v6 = vld [vmem:[#allocation3 + $0x20] sm:$0xff]  ;;  %s3707_s19 = sld [smem:[#allocation18_spill]]  ;;  %s2121_s15 = sshll.u32 %s3403_s29, 8 }
  0x6b   : > { %s479_s25 = scalar_select %p478_p4, %s3403_s29, 1  ;;  %v2723_v5 = vpack.c.bf16 %v488_v4, %v487_v2  ;;  %v490_v7 = vld [vmem:[#allocation3 + $0x28] sm:$0xff]  ;;  %v666_v10 = vld [vmem:[#allocation3 + $0x60] sm:$0xff]  ;;  %v668_v13 = vld [vmem:[#allocation3 + $0x70] sm:$0xff] }
  0x6c   : > { %2720 = vmatprep.subr.bf16.mxu0 %v2719_v3  ;;  %v2727_v9 = vpack.c.bf16 %v490_v7, %v489_v6  ;;  %v667_v11 = vld [vmem:[#allocation3 + $0x68] sm:$0xff]  ;;  %v669_v14 = vld [vmem:[#allocation3 + $0x78] sm:$0xff]  ;;  %v494_v16 = vld [vmem:[#allocation3 + $0x30] sm:$0xff]  ;;  %s3708_s30 = sld [smem:[#allocation21_spill]]  ;;  %s3309_s29 = smov [#allocation9]  }
  0x6d   : > { %s3071_s23 = smul.u32 24, %s479_s25  ;;  %2722 = vmatpush3.bf16.msra.mxu0 %v2719_v3  ;;  %v2731_v12 = vpack.c.bf16 %v667_v11, %v666_v10  ;;  %v2735_v17 = vpack.c.bf16 %v669_v14, %v668_v13  ;;  %v495_v19 = vld [vmem:[#allocation3 + $0x38] sm:$0xff]  ;;  %v670_v20 = vld [vmem:[#allocation3 + $0x80] sm:$0xff]  ;;  %v671_v21 = vld [vmem:[#allocation3 + $0x88] sm:$0xff]  ;;  %s475_s25 = sand.u32 1, %s3293_s26  }
  0x6e   : > { %2724 = vmatprep.subr.bf16.mxu0 %v2723_v5  ;;  %v2707_v22 = vpack.c.bf16 %v495_v19, %v494_v16  ;;  %v496_v23 = vld [vmem:[#allocation3 + $0x40] sm:$0xff]  ;;  %v497_v24 = vld [vmem:[#allocation3 + $0x48] sm:$0xff]  ;;  %v498_v26 = vld [vmem:[#allocation3 + $0x50] sm:$0xff]  ;;  %v2739_v28 = vpack.c.bf16 %v671_v21, %v670_v20  ;;  %s3235_s20 = sshll.u32 %s3309_s29, 4  ;;  %s3236_s20 = int_to_ptr.vmem [resolvable:$false] %s3235_s20 }
  0x6f   : > { %s3544_s17 = scalar_lea.vmem %s3661_s0, %s3071_s23  ;;  %v2711_v25 = vpack.c.bf16 %v497_v24, %v496_v23  ;;  %v499_v27 = vld [vmem:[#allocation3 + $0x58] sm:$0xff]  ;;  %v758_v30 = vld [vmem:[#allocation3 + $0x90] sm:$0xff]  ;;  %v760_v36 = vld [vmem:[#allocation3 + $0xa0] sm:$0xff]  ;;  %s2091_s23 = sshll.u32 %s475_s25, 4 }
  0x70   : > { %v483_v8 = vld [vmem:[%s3544_s17] sm:$0xff]  ;;  %v484_v15 = vld [vmem:[%s3544_s17 + $0x8] sm:$0xff]  ;;  %2708 = vmatprep.subr.bf16.mxu1 %v2707_v22  ;;  %v759_v31 = vld [vmem:[#allocation3 + $0x98] sm:$0xff]  ;;  %v2715_v32 = vpack.c.bf16 %v499_v27, %v498_v26  ;;  %s477_s21 = scalar_lea.vmem [#allocation9], %s2091_s23  ;;  %s3620_s23 = scalar_lea.sflag [#allocation5], %s475_s25 }
  0x71   : > { %2349 = vmatprep.mubr.msk.f32.mxu0 %vm500_vm0, %v483_v8  ;;  %2726 = vmatpush3.bf16.msra.mxu0 %v2723_v5  ;;  %v663_v18 = vld [vmem:[%s3544_s17 + $0x2] sm:$0xff]  ;;  %v1347_v34 = vld [vmem:[#allocation6 + $0x108] sm:$0xff]  ;;  %v2743_v35 = vpack.c.bf16 %v759_v31, %v758_v30  ;;  %v1348_v40 = vld [vmem:[#allocation6 + $0x110] sm:$0xff]  ;;  %s1988_s24 = sshll.u32 %s477_s21, 4  ;;  %p3709_p7 = scmp.ne.s32.totalorder %s3707_s19, 0  ;;  %s3613_s24 = int_to_ptr.vmem [resolvable:$true] %s1988_s24 }
  0x72   : > { %2728 = vmatprep.subr.bf16.mxu0 %v2727_v9  ;;  %v491_v29 = vld [vmem:[%s3544_s17 + $0x1] sm:$0xff]  ;;  %2710 = vmatpush3.bf16.msra.mxu1 %v2707_v22  ;;  %v664_v39 = vld [vmem:[%s3544_s17 + $0xa] sm:$0xff]  ;;  %v850_v51 = vld [vmem:[#allocation3 + $0xc0] sm:$0xff]  ;;  %s3618_s12 = scalar_lea.hbm %s3708_s30, %s2121_s15  ;;  %s3231_s16 = scalar_lea.vmem %s3613_s24, 256 }
  0x73   : > { %2334 = vmatprep.mubr.msk.f32.mxu1 %vm500_vm0, %v491_v29  ;;  %2712 = vmatprep.subr.bf16.mxu1 %v2711_v25  ;;  %v1346_v33 = vld [vmem:[#allocation6 + $0x100] sm:$0xff]  ;;  %v761_v37 = vld [vmem:[#allocation3 + $0xa8] sm:$0xff]  ;;  %v763_v45 = vld [vmem:[#allocation3 + $0xb8] sm:$0xff]  ;;  %p3232_p12 = scmp.ne.s32.totalorder %s3613_s24, %s3231_s16  ;;  %p3238_p13 = scmp.lt.s32.totalorder %s3613_s24, %s3236_s20 }
  0x74   : > { %v2855_v38 = vpack.c.bf16 %v1347_v34, %v1346_v33  ;;  %v1349_v41 = vld [vmem:[#allocation6 + $0x118] sm:$0xff]  ;;  %v2747_v42 = vpack.c.bf16 %v761_v37, %v760_v36  ;;  %v762_v44 = vld [vmem:[#allocation3 + $0xb0] sm:$0xff]  ;;  %v1351_v49 = vld [vmem:[#allocation6 + $0x128] sm:$0xff] }
  0x75   : > { %2730 = vmatpush3.bf16.msra.mxu0 %v2727_v9  ;;  %v755_v43 = vld [vmem:[%s3544_s17 + $0x3] sm:$0xff]  ;;  %v2859_v47 = vpack.c.bf16 %v1349_v41, %v1348_v40  ;;  %v2751_v50 = vpack.c.bf16 %v763_v45, %v762_v44  ;;  %v853_v56 = vld [vmem:[#allocation3 + $0xd8] sm:$0xff]  ;;  %v854_v60 = vld [vmem:[#allocation3 + $0xe0] sm:$0xff]  ;;  %p3233_p8 = pnand %p3232_p12, %p3709_p7 }
  0x76   : > { %2732 = vmatprep.subr.bf16.mxu0 %v2731_v12  ;;  %2714 = vmatpush3.bf16.msra.mxu1 %v2711_v25  ;;  %v492_v46 = vld [vmem:[%s3544_s17 + $0x9] sm:$0xff]  ;;  %v851_v52 = vld [vmem:[#allocation3 + $0xc8] sm:$0xff]  ;;  %v944_v2 = vld [vmem:[#allocation3 + $0x100] sm:$0xff] }
  0x77   : > { %2716 = vmatprep.subr.bf16.mxu1 %v2715_v32  ;;  %v1350_v48 = vld [vmem:[#allocation6 + $0x120] sm:$0xff]  ;;  %v2755_v54 = vpack.c.bf16 %v851_v52, %v850_v51  ;;  %v855_v61 = vld [vmem:[#allocation3 + $0xe8] sm:$0xff]  ;;  %v943_v0 = vld [vmem:[#allocation3 + $0xf8] sm:$0xff]  ;;  %p3234_p11 = pneg %p3233_p8 }
  0x78   : > { %2350 = vmatmul.mubr.msk.f32.vlgmr.msra.gmra.mrb[0].mxu0 %vm500_vm0, %v484_v15  ;;  %v2863_v53 = vpack.c.bf16 %v1351_v49, %v1350_v48  ;;  %v852_v55 = vld [vmem:[#allocation3 + $0xd0] sm:$0xff]  ;;  %v2763_v62 = vpack.c.bf16 %v855_v61, %v854_v60  ;;  %v945_v3 = vld [vmem:[#allocation3 + $0x108] sm:$0xff]  ;;  %v947_v8 = vld [vmem:[#allocation3 + $0x118] sm:$0xff] }
  0x79   : > { %2734 = vmatpush3.bf16.msra.mxu0 %v2731_v12  ;;  %2364 = vmatprep.mubr.msk.f32.mxu0 %vm500_vm0, %v663_v18  ;;  %v756_v57 = vld [vmem:[%s3544_s17 + $0xb] sm:$0xff]  ;;  %v2759_v58 = vpack.c.bf16 %v853_v56, %v852_v55  ;;  %v2771_v5 = vpack.c.bf16 %v945_v3, %v944_v2  ;;  %v1034_v10 = vld [vmem:[#allocation3 + $0x120] sm:$0xff]  ;;  %v1035_v11 = vld [vmem:[#allocation3 + $0x128] sm:$0xff]  ;;  %v3308_v55 = vmov 0.0  }
  0x7a   : > { %2736 = vmatprep.subr.bf16.mxu0 %v2735_v17  ;;  %2718 = vmatpush3.bf16.msra.mxu1 %v2715_v32  ;;  %v847_v59 = vld [vmem:[%s3544_s17 + $0x4] sm:$0xff]  ;;  %v848_v4 = vld [vmem:[%s3544_s17 + $0xc] sm:$0xff]  ;;  %v2779_v12 = vpack.c.bf16 %v1035_v11, %v1034_v10  ;;  %v1038_v18 = vld [vmem:[#allocation3 + $0x140] sm:$0xff]  ;;  %1152 = vst [vmem:[#allocation2] sm:$0x7] %v3308_v55 }
  0x7b   : > { %2856 = vmatprep.subr.bf16.mxu1 %v2855_v38  ;;  %v942_v63 = vld [vmem:[#allocation3 + $0xf0] sm:$0xff]  ;;  %v1037_v14 = vld [vmem:[#allocation3 + $0x138] sm:$0xff]  ;;  %v1039_v19 = vld [vmem:[#allocation3 + $0x148] sm:$0xff]  ;;  %1153 = vst [vmem:[#allocation2 + $0x13] sm:$0x7] %v3308_v55 }
  0x7c   : > { %v2767_v1 = vpack.c.bf16 %v943_v0, %v942_v63  ;;  %v939_v6 = vld [vmem:[%s3544_s17 + $0x5] sm:$0xff]  ;;  %v940_v15 = vld [vmem:[%s3544_s17 + $0xd] sm:$0xff]  ;;  %v2787_v20 = vpack.c.bf16 %v1039_v19, %v1038_v18  ;;  %v1179_v24 = vld [vmem:[#allocation6 + $0x90] sm:$0xff] }
  0x7d   : > { %2738 = vmatpush3.bf16.msra.mxu0 %v2735_v17  ;;  %2335 = vmatmul.mubr.msk.f32.vlgmr.msra.gmra.mrb[0].mxu1 %vm500_vm0, %v492_v46  ;;  %v946_v7 = vld [vmem:[#allocation3 + $0x110] sm:$0xff]  ;;  %v1178_v22 = vld [vmem:[#allocation6 + $0x88] sm:$0xff]  ;;  %v1180_v25 = vld [vmem:[#allocation6 + $0x98] sm:$0xff] }
  0x7e   : > { %2740 = vmatprep.subr.bf16.mxu0 %v2739_v28  ;;  %2858 = vmatpush3.bf16.msra.mxu1 %v2855_v38  ;;  %v2775_v9 = vpack.c.bf16 %v947_v8, %v946_v7  ;;  %v1036_v13 = vld [vmem:[#allocation3 + $0x130] sm:$0xff]  ;;  %v2795_v27 = vpack.c.bf16 %v1180_v25, %v1179_v24  ;;  %v1182_v29 = vld [vmem:[#allocation6 + $0xa8] sm:$0xff]  ;;  %v1183_v31 = vld [vmem:[#allocation6 + $0xb0] sm:$0xff] }
  0x7f   : > { %2860 = vmatprep.subr.bf16.mxu1 %v2859_v47  ;;  %v2783_v16 = vpack.c.bf16 %v1037_v14, %v1036_v13  ;;  %v1031_v17 = vld [vmem:[%s3544_s17 + $0x6] sm:$0xff]  ;;  %v1032_v26 = vld [vmem:[%s3544_s17 + $0xe] sm:$0xff]  ;;  %v1352_v33 = vld [vmem:[#allocation6 + $0x130] sm:$0xff]  ;;  %s3237_s17 = scalar_lea.vmem %s3236_s20, 512 }
  0x80   : > { %v1177_v21 = vld [vmem:[#allocation6 + $0x80] sm:$0xff]  ;;  %v1184_v32 = vld [vmem:[#allocation6 + $0xb8] sm:$0xff]  ;;  %v1186_v38 = vld [vmem:[#allocation6 + $0xc8] sm:$0xff]  ;;  %p3239_p1 = scmp.lt.s32.totalorder %s3237_s17, %s3231_s16 }
  0x81   : > { %2742 = vmatpush3.bf16.msra.mxu0 %v2739_v28  ;;  %v2791_v23 = vpack.c.bf16 %v1178_v22, %v1177_v21  ;;  %v1181_v28 = vld [vmem:[#allocation6 + $0xa0] sm:$0xff]  ;;  %v2803_v34 = vpack.c.bf16 %v1184_v32, %v1183_v31  ;;  %v1355_v41 = vld [vmem:[#allocation6 + $0x148] sm:$0xff]  ;;  %v1188_v44 = vld [vmem:[#allocation6 + $0xd8] sm:$0xff] }
  0x82   : > { %2744 = vmatprep.subr.bf16.mxu0 %v2743_v35  ;;  %2862 = vmatpush3.bf16.msra.mxu1 %v2859_v47  ;;  %v2799_v30 = vpack.c.bf16 %v1182_v29, %v1181_v28  ;;  %v1185_v37 = vld [vmem:[#allocation6 + $0xc0] sm:$0xff]  ;;  %v1356_v46 = vld [vmem:[#allocation6 + $0x150] sm:$0xff]  ;;  %v1357_v47 = vld [vmem:[#allocation6 + $0x158] sm:$0xff]  ;;  %p3240_p6 = por %p3239_p1, %p3238_p13 }
  0x83   : > { %2864 = vmatprep.subr.bf16.mxu1 %v2863_v53  ;;  %v1354_v40 = vld [vmem:[#allocation6 + $0x140] sm:$0xff]  ;;  %v2875_v48 = vpack.c.bf16 %v1357_v47, %v1356_v46  ;;  %v1191_v56 = vld [vmem:[#allocation6 + $0xf0] sm:$0xff]  ;;  %v1361_v60 = vld [vmem:[#allocation6 + $0x178] sm:$0xff] }
  0x84   : > { %2365 = vmatmul.mubr.msk.f32.vlgmr.msra.gmra.mrb[0].mxu0 %vm500_vm0, %v664_v39  ;;  %v2807_v39 = vpack.c.bf16 %v1186_v38, %v1185_v37  ;;  %v1189_v49 = vld [vmem:[#allocation6 + $0xe0] sm:$0xff]  ;;  %v1159_v63 = vld [vmem:[#allocation6 + $0x8] sm:$0xff]  ;;  %v2107_v7 = vld [vmem:[%s3663_s2] ss:$0 sm:$0xff]  ;;  %p3241_p9 = pnand %p3240_p6, %p3234_p11 }
  0x85   : > { %2746 = vmatpush3.bf16.msra.mxu0 %v2743_v35  ;;  %2379 = vmatprep.mubr.msk.f32.mxu0 %vm500_vm0, %v755_v43  ;;  %v1353_v35 = vld [vmem:[#allocation6 + $0x138] sm:$0xff]  ;;  %v1187_v43 = vld [vmem:[#allocation6 + $0xd0] sm:$0xff]  ;;  %v1358_v51 = vld [vmem:[#allocation6 + $0x160] sm:$0xff] }
  0x86   : > { %2748 = vmatprep.subr.bf16.mxu0 %v2747_v42  ;;  %2866 = vmatpush3.bf16.msra.mxu1 %v2863_v53  ;;  %v2867_v36 = vpack.c.bf16 %v1353_v35, %v1352_v33  ;;  %v2811_v45 = vpack.c.bf16 %v1188_v44, %v1187_v43  ;;  %v1359_v53 = vld [vmem:[#allocation6 + $0x168] sm:$0xff]  ;;  %v1442_v0 = vld [vmem:[#allocation6 + $0x180] sm:$0xff]  ;;  %v1160_v21 = vld [vmem:[#allocation6 + $0x10] sm:$0xff] }
  0x87   : > { %v1443_v2 = vld [vmem:[#allocation6 + $0x188] sm:$0xff]  ;;  %v1161_v22 = vld [vmem:[#allocation6 + $0x18] sm:$0xff]  ;;  %v1162_v25 = vld [vmem:[#allocation6 + $0x20] sm:$0xff] }
  0x88   : > { %2868 = vmatprep.subr.bf16.mxu1 %v2867_v36  ;;  %v2887_v3 = vpack.c.bf16 %v1443_v2, %v1442_v0  ;;  %v1445_v24 = vld [vmem:[#allocation6 + $0x198] sm:$0xff]  ;;  %v2827_v31 = vpack.c.bf16 %v1161_v22, %v1160_v21  ;;  %v1446_v33 = vld [vmem:[#allocation6 + $0x1a0] sm:$0xff]  ;;  %v1164_v38 = vld [vmem:[#allocation6 + $0x30] sm:$0xff] }
  0x89   : > { %2750 = vmatpush3.bf16.msra.mxu0 %v2747_v42  ;;  %v2871_v42 = vpack.c.bf16 %v1355_v41, %v1354_v40  ;;  %v1448_v40 = vld [vmem:[#allocation6 + $0x1b0] sm:$0xff]  ;;  %v1449_v41 = vld [vmem:[#allocation6 + $0x1b8] sm:$0xff]  ;;  %v1166_v44 = vld [vmem:[#allocation6 + $0x40] sm:$0xff] }
  0x8a   : > { %2752 = vmatprep.subr.bf16.mxu0 %v2751_v50  ;;  %2870 = vmatpush3.bf16.msra.mxu1 %v2867_v36  ;;  %v2899_v43 = vpack.c.bf16 %v1449_v41, %v1448_v40  ;;  %v1450_v46 = vld [vmem:[#allocation6 + $0x1c0] sm:$0xff]  ;;  %v1451_v47 = vld [vmem:[#allocation6 + $0x1c8] sm:$0xff]  ;;  %v1456_v0 = vld [vmem:[#allocation6 + $0x1f0] sm:$0xff] }
  0x8b   : > { %2872 = vmatprep.subr.bf16.mxu1 %v2871_v42  ;;  %v1547_v21 = vld [vmem:[#allocation6 + $0x248] sm:$0xff] }
  0x8c   : > { %v1639_v40 = vld [vmem:[#allocation6 + $0x2a8] sm:$0xff] }
  0x8d   : > { %2754 = vmatpush3.bf16.msra.mxu0 %v2751_v50  ;;  %v1190_v50 = vld [vmem:[#allocation6 + $0xe8] sm:$0xff] }
  0x8e   : > { %2756 = vmatprep.subr.bf16.mxu0 %v2755_v54  ;;  %2874 = vmatpush3.bf16.msra.mxu1 %v2871_v42  ;;  %v2815_v52 = vpack.c.bf16 %v1190_v50, %v1189_v49  ;;  %v2903_v49 = vpack.c.bf16 %v1451_v47, %v1450_v46  ;;  %v1168_v50 = vld [vmem:[#allocation6 + $0x50] sm:$0xff]  ;;  %v1642_v46 = vld [vmem:[#allocation6 + $0x2c0] sm:$0xff]  ;;  %v1643_v47 = vld [vmem:[#allocation6 + $0x2c8] sm:$0xff] }
  0x8f   : > { %2876 = vmatprep.subr.bf16.mxu1 %v2875_v48 }
  0x90   : > { %2380 = vmatmul.mubr.msk.f32.vlgmr.msra.gmra.mrb[0].mxu0 %vm500_vm0, %v756_v57  ;;  %v1192_v57 = vld [vmem:[#allocation6 + $0xf8] sm:$0xff] }
  0x91   : > { %2758 = vmatpush3.bf16.msra.mxu0 %v2755_v54  ;;  %2394 = vmatprep.mubr.msk.f32.mxu0 %vm500_vm0, %v847_v59  ;;  %v2879_v54 = vpack.c.bf16 %v1359_v53, %v1358_v51  ;;  %v2819_v59 = vpack.c.bf16 %v1192_v57, %v1191_v56  ;;  %v1169_v51 = vld [vmem:[#allocation6 + $0x58] sm:$0xff]  ;;  %v1170_v56 = vld [vmem:[#allocation6 + $0x60] sm:$0xff]  ;;  %v1171_v57 = vld [vmem:[#allocation6 + $0x68] sm:$0xff] }
  0x92   : > { %2760 = vmatprep.subr.bf16.mxu0 %v2759_v58  ;;  %2878 = vmatpush3.bf16.msra.mxu1 %v2875_v48  ;;  %v1453_v53 = vld [vmem:[#allocation6 + $0x1d8] sm:$0xff] }
  0x93   : > { %2880 = vmatprep.subr.bf16.mxu1 %v2879_v54 }
  0x95   : > { %2762 = vmatpush3.bf16.msra.mxu0 %v2759_v58  ;;  %v1360_v58 = vld [vmem:[#allocation6 + $0x170] sm:$0xff] }
  0x96   : > { %2764 = vmatprep.subr.bf16.mxu0 %v2763_v62  ;;  %2882 = vmatpush3.bf16.msra.mxu1 %v2879_v54  ;;  %v2883_v61 = vpack.c.bf16 %v1361_v60, %v1360_v58  ;;  %v2843_v54 = vpack.c.bf16 %v1169_v51, %v1168_v50  ;;  %v1454_v58 = vld [vmem:[#allocation6 + $0x1e0] sm:$0xff]  ;;  %v2847_v60 = vpack.c.bf16 %v1171_v57, %v1170_v56  ;;  %v1645_v50 = vld [vmem:[#allocation6 + $0x2d8] sm:$0xff] }
  0x97   : > { %v1649_v56 = vld [vmem:[#allocation6 + $0x2f8] sm:$0xff] }
  0x98   : > { %2884 = vmatprep.subr.bf16.mxu1 %v2883_v61 }
  0x99   : > { %2766 = vmatpush3.bf16.msra.mxu0 %v2763_v62  ;;  %v1158_v62 = vld [vmem:[#allocation6] sm:$0xff] }
  0x9a   : > { %2768 = vmatprep.subr.bf16.mxu0 %v2767_v1  ;;  %2886 = vmatpush3.bf16.msra.mxu1 %v2883_v61 }
  0x9b   : > { %2888 = vmatprep.subr.bf16.mxu1 %v2887_v3 }
  0x9c   : > { %2395 = vmatmul.mubr.msk.f32.vlgmr.msra.gmra.mrb[0].mxu0 %vm500_vm0, %v848_v4 }
  0x9d   : > { %2770 = vmatpush3.bf16.msra.mxu0 %v2767_v1  ;;  %2409 = vmatprep.mubr.msk.f32.mxu0 %vm500_vm0, %v939_v6  ;;  %v2823_v1 = vpack.c.bf16 %v1159_v63, %v1158_v62  ;;  %v1172_v62 = vld [vmem:[#allocation6 + $0x70] sm:$0xff]  ;;  %v1173_v63 = vld [vmem:[#allocation6 + $0x78] sm:$0xff] }
  0x9e   : > { %2772 = vmatprep.subr.bf16.mxu0 %v2771_v5  ;;  %v2851_v2 = vpack.c.bf16 %v1173_v63, %v1172_v62  ;;  %v1733_v62 = vld [vmem:[#allocation6 + $0x318] sm:$0xff] }
  0xa1   : > { %2774 = vmatpush3.bf16.msra.mxu0 %v2771_v5 }
  0xa2   : > { %2776 = vmatprep.subr.bf16.mxu0 %v2775_v9 }
  0xa5   : > { %2778 = vmatpush3.bf16.msra.mxu0 %v2775_v9 }
  0xa6   : > { %2780 = vmatprep.subr.bf16.mxu0 %v2779_v12 }
  0xa8   : > { %2410 = vmatmul.mubr.msk.f32.vlgmr.msra.gmra.mrb[0].mxu0 %vm500_vm0, %v940_v15  ;;  %v2109_v15 = vld [vmem:[%s3665_s4] ss:$0 sm:$0xff] }
  0xa9   : > { %2782 = vmatpush3.bf16.msra.mxu0 %v2779_v12  ;;  %2424 = vmatprep.mubr.msk.f32.mxu0 %vm500_vm0, %v1031_v17  ;;  %v2108_v12 = vld [vmem:[%s3664_s3] ss:$0 sm:$0xff] }
  0xaa   : > { %2784 = vmatprep.subr.bf16.mxu0 %v2783_v16 }
  0xad   : > { %2786 = vmatpush3.bf16.msra.mxu0 %v2783_v16 }
  0xae   : > { %2788 = vmatprep.subr.bf16.mxu0 %v2787_v20 }
  0xb1   : > { %2790 = vmatpush3.bf16.msra.mxu0 %v2787_v20 }
  0xb2   : > { %2792 = vmatprep.subr.bf16.mxu0 %v2791_v23 }
  0xb4   : > { %2425 = vmatmul.mubr.msk.f32.vlgmr.msra.gmra.mrb[0].mxu0 %vm500_vm0, %v1032_v26  ;;  %v1163_v26 = vld [vmem:[#allocation6 + $0x28] sm:$0xff] }
  0xb5   : > { %2794 = vmatpush3.bf16.msra.mxu0 %v2791_v23  ;;  %v1444_v23 = vld [vmem:[#allocation6 + $0x190] sm:$0xff]  ;;  %v2831_v36 = vpack.c.bf16 %v1163_v26, %v1162_v25  ;;  %v1550_v26 = vld [vmem:[#allocation6 + $0x260] sm:$0xff] }
  0xb6   : > { %2796 = vmatprep.subr.bf16.mxu0 %v2795_v27  ;;  %v2891_v32 = vpack.c.bf16 %v1445_v24, %v1444_v23  ;;  %v1548_v23 = vld [vmem:[#allocation6 + $0x250] sm:$0xff]  ;;  %v1549_v24 = vld [vmem:[#allocation6 + $0x258] sm:$0xff] }
  0xb7   : > { %v2939_v25 = vpack.c.bf16 %v1549_v24, %v1548_v23  ;;  %v1856_v23 = vld [vmem:[#allocation8 + $0x10] sm:$0xff] }
  0xb9   : > { %2798 = vmatpush3.bf16.msra.mxu0 %v2795_v27 }
  0xba   : > { %2800 = vmatprep.subr.bf16.mxu0 %v2799_v30 }
  0xbd   : > { %2802 = vmatpush3.bf16.msra.mxu0 %v2799_v30 }
  0xbe   : > { %2804 = vmatprep.subr.bf16.mxu0 %v2803_v34 }
  0xc1   : > { %2806 = vmatpush3.bf16.msra.mxu0 %v2803_v34  ;;  %v1447_v34 = vld [vmem:[#allocation6 + $0x1a8] sm:$0xff] }
  0xc2   : > { %2808 = vmatprep.subr.bf16.mxu0 %v2807_v39  ;;  %v2895_v37 = vpack.c.bf16 %v1447_v34, %v1446_v33  ;;  %v1635_v33 = vld [vmem:[#allocation6 + $0x288] sm:$0xff] }
  0xc5   : > { %2810 = vmatpush3.bf16.msra.mxu0 %v2807_v39  ;;  %v1165_v39 = vld [vmem:[#allocation6 + $0x38] sm:$0xff] }
  0xc6   : > { %2812 = vmatprep.subr.bf16.mxu0 %v2811_v45  ;;  %v2835_v42 = vpack.c.bf16 %v1165_v39, %v1164_v38  ;;  %v1638_v39 = vld [vmem:[#allocation6 + $0x2a0] sm:$0xff] }
  0xc9   : > { %2814 = vmatpush3.bf16.msra.mxu0 %v2811_v45  ;;  %v1167_v45 = vld [vmem:[#allocation6 + $0x48] sm:$0xff] }
  0xca   : > { %2816 = vmatprep.subr.bf16.mxu0 %v2815_v52  ;;  %v2839_v48 = vpack.c.bf16 %v1167_v45, %v1166_v44  ;;  %v1641_v44 = vld [vmem:[#allocation6 + $0x2b8] sm:$0xff] }
  0xcd   : > { %2818 = vmatpush3.bf16.msra.mxu0 %v2815_v52  ;;  %v1452_v52 = vld [vmem:[#allocation6 + $0x1d0] sm:$0xff] }
  0xce   : > { %2820 = vmatprep.subr.bf16.mxu0 %v2819_v59  ;;  %v2907_v55 = vpack.c.bf16 %v1453_v53, %v1452_v52  ;;  %v1646_v52 = vld [vmem:[#allocation6 + $0x2e0] sm:$0xff]  ;;  %v1647_v53 = vld [vmem:[#allocation6 + $0x2e8] sm:$0xff] }
  0xd1   : > { %2822 = vmatpush3.bf16.msra.mxu0 %v2819_v59  ;;  %v1455_v59 = vld [vmem:[#allocation6 + $0x1e8] sm:$0xff] }
  0xd2   : > { %2824 = vmatprep.subr.bf16.mxu0 %v2823_v1  ;;  %v2911_v61 = vpack.c.bf16 %v1455_v59, %v1454_v58  ;;  %v1730_v58 = vld [vmem:[#allocation6 + $0x300] sm:$0xff]  ;;  %v1731_v59 = vld [vmem:[#allocation6 + $0x308] sm:$0xff] }
 0x150   : > { %v2336_v4 = vpop.f32.mrb[0].mxu1 }
 0x151   : > { %v573_v5 = vpop.f32.mrb[1].mxu1 }
 0x187   : > { %v2426_v6 = vpop.f32.mrb[0].mxu0 }
 0x188   : > { %v3047_v8 = vadd.f32 %v2426_v6, %v2336_v4  ;;  %v1112_v9 = vpop.f32.mrb[1].mxu0  ;;  %v1538_v4 = vld [vmem:[#allocation6 + $0x200] sm:$0xff] }
 0x189   : > { %v3048_v10 = vadd.f32 %v1112_v9, %v573_v5  ;;  %v1539_v5 = vld [vmem:[#allocation6 + $0x208] sm:$0xff] }
 0x18a   : > { %v1131_v11 = vadd.f32 %v3047_v8, %v2107_v7  ;;  %v2919_v6 = vpack.c.bf16 %v1539_v5, %v1538_v4  ;;  %v1541_v8 = vld [vmem:[#allocation6 + $0x218] sm:$0xff]  ;;  %v1736_v5 = vld [vmem:[#allocation6 + $0x330] sm:$0xff] }
 0x18b   : > { %v1130_v13 = vadd.f32 %v3048_v10, %v2107_v7  ;;  %v1540_v7 = vld [vmem:[#allocation6 + $0x210] sm:$0xff] }
 0x18c   : > { %v1133_v14 = vmax.f32 %v1131_v11, 0.0  ;;  %v2923_v9 = vpack.c.bf16 %v1541_v8, %v1540_v7  ;;  %v1542_v11 = vld [vmem:[#allocation6 + $0x220] sm:$0xff] }
 0x18d   : > { %v1132_v16 = vmax.f32 %v1130_v13, 0.0  ;;  %v1738_v8 = vld [vmem:[#allocation6 + $0x340] sm:$0xff] }
 0x18e   : > { %v1142_v17 = vmul.f32 %v2108_v12, %v1133_v14 }
 0x18f   : > { %v1141_v18 = vmul.f32 %v2108_v12, %v1132_v16  ;;  %v1543_v12 = vld [vmem:[#allocation6 + $0x228] sm:$0xff]  ;;  %v1545_v16 = vld [vmem:[#allocation6 + $0x238] sm:$0xff] }
 0x190   : > { %v3583_v19 = vadd.f32 %v2109_v15, %v1142_v17  ;;  %v2927_v14 = vpack.c.bf16 %v1543_v12, %v1542_v11  ;;  %v1740_v11 = vld [vmem:[#allocation6 + $0x350] sm:$0xff]  ;;  %v1741_v12 = vld [vmem:[#allocation6 + $0x358] sm:$0xff] }
 0x191   : > { %v3585_v20 = vadd.f32 %v2109_v15, %v1141_v18  ;;  %v1544_v15 = vld [vmem:[#allocation6 + $0x230] sm:$0xff]  ;;  %v1546_v18 = vld [vmem:[#allocation6 + $0x240] sm:$0xff] }
 0x192   : > { %1155 = vst [vmem:[#allocation2 + $0xb] sm:$0xff] %v3583_v19  ;;  %v2931_v17 = vpack.c.bf16 %v1545_v16, %v1544_v15  ;;  %v2935_v22 = vpack.c.bf16 %v1547_v21, %v1546_v18  ;;  %v1743_v15 = vld [vmem:[#allocation6 + $0x368] sm:$0xff]  ;;  %v1745_v18 = vld [vmem:[#allocation6 + $0x378] sm:$0xff]  ;;  %v1854_v21 = vld [vmem:[#allocation8] sm:$0xff] }
 0x193   : > { %1154 = vst [vmem:[#allocation2 + $0x3] sm:$0xff] %v3585_v20 }
 0x199   : > { %v1536_v38 = vld [vmem:[#allocation2 + $0xc] sm:$0xff] }
 0x19a   : > { %v1174_v27 = vld [vmem:[#allocation2 + $0x1] sm:$0xff]  ;;  %v1175_v29 = vld [vmem:[#allocation2 + $0x9] sm:$0xff] }
 0x19b   : > { %v1343_v28 = vld [vmem:[#allocation2 + $0x2] sm:$0xff]  ;;  %2459 = vmatprep.mubr.f32.mxu0 %v1174_v27  ;;  %v1344_v30 = vld [vmem:[#allocation2 + $0xa] sm:$0xff] }
 0x19c   : > { %2529 = vmatprep.mubr.f32.mxu1 %v1343_v28  ;;  %2460 = vmatmul.mubr.f32.vlgmr.msra.gmra.mrb[2].mxu0 %v1175_v29  ;;  %v1156_v35 = vld [vmem:[#allocation2] sm:$0xff]  ;;  %v1157_v10 = vld [vmem:[#allocation2 + $0x8] sm:$0xff]  ;;  %v1551_v27 = vld [vmem:[#allocation6 + $0x268] sm:$0xff] }
 0x19d   : > { %2530 = vmatmul.mubr.f32.vlgmr.msra.gmra.mrb[2].mxu1 %v1344_v30  ;;  %2826 = vmatpush3.bf16.msra.mxu0 %v2823_v1  ;;  %v1457_v1 = vld [vmem:[#allocation6 + $0x1f8] sm:$0xff]  ;;  %v2943_v28 = vpack.c.bf16 %v1551_v27, %v1550_v26  ;;  %v1552_v29 = vld [vmem:[#allocation6 + $0x270] sm:$0xff] }
 0x19e   : > { %2890 = vmatpush3.bf16.msra.mxu1 %v2887_v3  ;;  %2494 = vmatprep.mubr.f32.mxu0 %v1156_v35  ;;  %v2915_v3 = vpack.c.bf16 %v1457_v1, %v1456_v0  ;;  %v1535_v13 = vld [vmem:[#allocation2 + $0x4] sm:$0xff]  ;;  %v1636_v35 = vld [vmem:[#allocation6 + $0x290] sm:$0xff]  ;;  %v1632_v0 = vld [vmem:[#allocation2 + $0xd] sm:$0xff] }
 0x19f   : > { %2564 = vmatprep.mubr.f32.mxu1 %v3585_v20  ;;  %2828 = vmatprep.subr.bf16.mxu0 %v2827_v31  ;;  %v1553_v30 = vld [vmem:[#allocation6 + $0x278] sm:$0xff]  ;;  %v1734_v1 = vld [vmem:[#allocation6 + $0x320] sm:$0xff] }
 0x1a0   : > { %2892 = vmatprep.subr.bf16.mxu1 %v2891_v32  ;;  %v1631_v41 = vld [vmem:[#allocation2 + $0x5] sm:$0xff] }
 0x1a1   : > { %2830 = vmatpush3.bf16.msra.mxu0 %v2827_v31  ;;  %v2947_v31 = vpack.c.bf16 %v1553_v30, %v1552_v29  ;;  %v1859_v29 = vld [vmem:[#allocation8 + $0x28] sm:$0xff] }
 0x1a2   : > { %2894 = vmatpush3.bf16.msra.mxu1 %v2891_v32  ;;  %2832 = vmatprep.subr.bf16.mxu0 %v2831_v36  ;;  %v1634_v32 = vld [vmem:[#allocation6 + $0x280] sm:$0xff] }
 0x1a3   : > { %2896 = vmatprep.subr.bf16.mxu1 %v2895_v37  ;;  %v2951_v34 = vpack.c.bf16 %v1635_v33, %v1634_v32  ;;  %v1861_v32 = vld [vmem:[#allocation8 + $0x38] sm:$0xff] }
 0x1a5   : > { %2834 = vmatpush3.bf16.msra.mxu0 %v2831_v36  ;;  %v1637_v36 = vld [vmem:[#allocation6 + $0x298] sm:$0xff] }
 0x1a6   : > { %2898 = vmatpush3.bf16.msra.mxu1 %v2895_v37  ;;  %2836 = vmatprep.subr.bf16.mxu0 %v2835_v42  ;;  %v2955_v37 = vpack.c.bf16 %v1637_v36, %v1636_v35  ;;  %v1863_v35 = vld [vmem:[#allocation8 + $0x48] sm:$0xff] }
 0x1a7   : > { %2900 = vmatprep.subr.bf16.mxu1 %v2899_v43  ;;  %v1728_v36 = vld [vmem:[#allocation2 + $0xe] sm:$0xff] }
 0x1a9   : > { %2838 = vmatpush3.bf16.msra.mxu0 %v2835_v42  ;;  %v2959_v42 = vpack.c.bf16 %v1639_v40, %v1638_v39  ;;  %v1865_v39 = vld [vmem:[#allocation8 + $0x58] sm:$0xff] }
 0x1aa   : > { %2902 = vmatpush3.bf16.msra.mxu1 %v2899_v43  ;;  %2840 = vmatprep.subr.bf16.mxu0 %v2839_v48  ;;  %v1640_v43 = vld [vmem:[#allocation6 + $0x2b0] sm:$0xff] }
 0x1ab   : > { %2904 = vmatprep.subr.bf16.mxu1 %v2903_v49  ;;  %v2963_v45 = vpack.c.bf16 %v1641_v44, %v1640_v43  ;;  %v1868_v44 = vld [vmem:[#allocation8 + $0x70] sm:$0xff] }
 0x1ad   : > { %2842 = vmatpush3.bf16.msra.mxu0 %v2839_v48  ;;  %v2967_v48 = vpack.c.bf16 %v1643_v47, %v1642_v46 }
 0x1ae   : > { %2906 = vmatpush3.bf16.msra.mxu1 %v2903_v49  ;;  %2844 = vmatprep.subr.bf16.mxu0 %v2843_v54  ;;  %v1644_v49 = vld [vmem:[#allocation6 + $0x2d0] sm:$0xff] }
 0x1af   : > { %2908 = vmatprep.subr.bf16.mxu1 %v2907_v55  ;;  %v2971_v51 = vpack.c.bf16 %v1645_v50, %v1644_v49  ;;  %v2110_v50 = vld [vmem:[%s3667_s6] ss:$0 sm:$0xff] }
 0x1b1   : > { %2846 = vmatpush3.bf16.msra.mxu0 %v2843_v54  ;;  %v2975_v54 = vpack.c.bf16 %v1647_v53, %v1646_v52 }
 0x1b2   : > { %2910 = vmatpush3.bf16.msra.mxu1 %v2907_v55  ;;  %2848 = vmatprep.subr.bf16.mxu0 %v2847_v60  ;;  %v1648_v55 = vld [vmem:[#allocation6 + $0x2f0] sm:$0xff] }
 0x1b3   : > { %2912 = vmatprep.subr.bf16.mxu1 %v2911_v61  ;;  %v2979_v57 = vpack.c.bf16 %v1649_v56, %v1648_v55  ;;  %v2111_v55 = vld [vmem:[%s3668_s7] ss:$0 sm:$0xff] }
 0x1b5   : > { %2850 = vmatpush3.bf16.msra.mxu0 %v2847_v60  ;;  %v2983_v60 = vpack.c.bf16 %v1731_v59, %v1730_v58  ;;  %v2112_v58 = vld [vmem:[%s3669_s8] ss:$0 sm:$0xff] }
 0x1b6   : > { %2914 = vmatpush3.bf16.msra.mxu1 %v2911_v61  ;;  %2852 = vmatprep.subr.bf16.mxu0 %v2851_v2  ;;  %v1732_v61 = vld [vmem:[#allocation6 + $0x310] sm:$0xff] }
 0x1b7   : > { %2916 = vmatprep.subr.bf16.mxu1 %v2915_v3  ;;  %v2987_v63 = vpack.c.bf16 %v1733_v62, %v1732_v61 }
 0x1b9   : > { %2854 = vmatpush3.bf16.msra.mxu0 %v2851_v2  ;;  %v1735_v2 = vld [vmem:[#allocation6 + $0x328] sm:$0xff] }
 0x1ba   : > { %2918 = vmatpush3.bf16.msra.mxu1 %v2915_v3  ;;  %v1727_v3 = vld [vmem:[#allocation2 + $0x6] sm:$0xff]  ;;  %v2991_v4 = vpack.c.bf16 %v1735_v2, %v1734_v1  ;;  %v2113_v2 = vld [vmem:[%s3671_s10] ss:$0 sm:$0xff] }
 0x1bb   : > { %2920 = vmatprep.subr.bf16.mxu1 %v2919_v6 }
 0x1bc   : > { %2495 = vmatmul.mubr.f32.vlgmr.msra.gmra.mrb[2].mxu0 %v1157_v10 }
 0x1bd   : > { %2565 = vmatmul.mubr.f32.vlgmr.msra.gmra.mrb[2].mxu1 %v3583_v19 }
 0x1be   : > { %2922 = vmatpush3.bf16.msra.mxu1 %v2919_v6  ;;  %2599 = vmatprep.mubr.f32.mxu1 %v1535_v13  ;;  %v1737_v6 = vld [vmem:[#allocation6 + $0x338] sm:$0xff]  ;;  %v3003_v13 = vpack.c.bf16 %v1741_v12, %v1740_v11 }
 0x1bf   : > { %2924 = vmatprep.subr.bf16.mxu1 %v2923_v9  ;;  %v2995_v7 = vpack.c.bf16 %v1737_v6, %v1736_v5  ;;  %v2114_v6 = vld [vmem:[%s3672_s11] ss:$0 sm:$0xff] }
 0x1c2   : > { %2926 = vmatpush3.bf16.msra.mxu1 %v2923_v9  ;;  %v1739_v9 = vld [vmem:[#allocation6 + $0x348] sm:$0xff] }
 0x1c3   : > { %2928 = vmatprep.subr.bf16.mxu1 %v2927_v14  ;;  %v2999_v10 = vpack.c.bf16 %v1739_v9, %v1738_v8 }
 0x1c6   : > { %2930 = vmatpush3.bf16.msra.mxu1 %v2927_v14  ;;  %v1742_v14 = vld [vmem:[#allocation6 + $0x360] sm:$0xff] }
 0x1c7   : > { %2932 = vmatprep.subr.bf16.mxu1 %v2931_v17  ;;  %v3007_v16 = vpack.c.bf16 %v1743_v15, %v1742_v14 }
 0x1ca   : > { %2934 = vmatpush3.bf16.msra.mxu1 %v2931_v17  ;;  %v1744_v17 = vld [vmem:[#allocation6 + $0x370] sm:$0xff] }
 0x1cb   : > { %2936 = vmatprep.subr.bf16.mxu1 %v2935_v22  ;;  %v3011_v26 = vpack.c.bf16 %v1745_v18, %v1744_v17 }
 0x1ce   : > { %2938 = vmatpush3.bf16.msra.mxu1 %v2935_v22  ;;  %v1855_v22 = vld [vmem:[#allocation8 + $0x8] sm:$0xff] }
 0x1cf   : > { %2940 = vmatprep.subr.bf16.mxu1 %v2939_v25  ;;  %v3015_v24 = vpack.c.bf16 %v1855_v22, %v1854_v21 }
 0x1d1   : > { %3016 = vmatprep.subr.bf16.mxu0 %v3015_v24 }
 0x1d2   : > { %2942 = vmatpush3.bf16.msra.mxu1 %v2939_v25  ;;  %v1857_v25 = vld [vmem:[#allocation8 + $0x18] sm:$0xff]  ;;  %3018 = vmatpush3.bf16.msra.mxu0 %v3015_v24 }
 0x1d3   : > { %2944 = vmatprep.subr.bf16.mxu1 %v2943_v28  ;;  %v3019_v27 = vpack.c.bf16 %v1857_v25, %v1856_v23 }
 0x1d5   : > { %3020 = vmatprep.subr.bf16.mxu0 %v3019_v27 }
 0x1d6   : > { %2946 = vmatpush3.bf16.msra.mxu1 %v2943_v28  ;;  %v1858_v28 = vld [vmem:[#allocation8 + $0x20] sm:$0xff]  ;;  %3022 = vmatpush3.bf16.msra.mxu0 %v3019_v27 }
 0x1d7   : > { %2948 = vmatprep.subr.bf16.mxu1 %v2947_v31  ;;  %v3023_v30 = vpack.c.bf16 %v1859_v29, %v1858_v28 }
 0x1d9   : > { %3024 = vmatprep.subr.bf16.mxu0 %v3023_v30 }
 0x1da   : > { %2950 = vmatpush3.bf16.msra.mxu1 %v2947_v31  ;;  %v1860_v31 = vld [vmem:[#allocation8 + $0x30] sm:$0xff]  ;;  %3026 = vmatpush3.bf16.msra.mxu0 %v3023_v30 }
 0x1db   : > { %2952 = vmatprep.subr.bf16.mxu1 %v2951_v34  ;;  %v3027_v33 = vpack.c.bf16 %v1861_v32, %v1860_v31 }
 0x1dd   : > { %2600 = vmatmul.mubr.f32.vlgmr.msra.gmra.mrb[2].mxu1 %v1536_v38  ;;  %3028 = vmatprep.subr.bf16.mxu0 %v3027_v33  ;;  %v1864_v38 = vld [vmem:[#allocation8 + $0x50] sm:$0xff] }
 0x1de   : > { %2954 = vmatpush3.bf16.msra.mxu1 %v2951_v34  ;;  %2634 = vmatprep.mubr.f32.mxu1 %v1631_v41  ;;  %v1862_v34 = vld [vmem:[#allocation8 + $0x40] sm:$0xff]  ;;  %v3035_v40 = vpack.c.bf16 %v1865_v39, %v1864_v38 }
 0x1df   : > { %2956 = vmatprep.subr.bf16.mxu1 %v2955_v37  ;;  %3030 = vmatpush3.bf16.msra.mxu0 %v3027_v33  ;;  %v1866_v41 = vld [vmem:[#allocation8 + $0x60] sm:$0xff] }
 0x1e2   : > { %2958 = vmatpush3.bf16.msra.mxu1 %v2955_v37  ;;  %v3031_v37 = vpack.c.bf16 %v1863_v35, %v1862_v34 }
 0x1e3   : > { %2960 = vmatprep.subr.bf16.mxu1 %v2959_v42 }
 0x1e4   : > { %3032 = vmatprep.subr.bf16.mxu0 %v3031_v37 }
 0x1e5   : > { %3034 = vmatpush3.bf16.msra.mxu0 %v3031_v37 }
 0x1e6   : > { %2962 = vmatpush3.bf16.msra.mxu1 %v2959_v42  ;;  %3036 = vmatprep.subr.bf16.mxu0 %v3035_v40  ;;  %v1867_v42 = vld [vmem:[#allocation8 + $0x68] sm:$0xff] }
 0x1e7   : > { %2964 = vmatprep.subr.bf16.mxu1 %v2963_v45  ;;  %v3039_v43 = vpack.c.bf16 %v1867_v42, %v1866_v41 }
 0x1e9   : > { %3038 = vmatpush3.bf16.msra.mxu0 %v3035_v40 }
 0x1ea   : > { %2966 = vmatpush3.bf16.msra.mxu1 %v2963_v45  ;;  %3040 = vmatprep.subr.bf16.mxu0 %v3039_v43  ;;  %v1869_v45 = vld [vmem:[#allocation8 + $0x78] sm:$0xff] }
 0x1eb   : > { %2968 = vmatprep.subr.bf16.mxu1 %v2967_v48  ;;  %v3043_v46 = vpack.c.bf16 %v1869_v45, %v1868_v44 }
 0x1ed   : > { %3042 = vmatpush3.bf16.msra.mxu0 %v3039_v43 }
 0x1ee   : > { %2970 = vmatpush3.bf16.msra.mxu1 %v2967_v48  ;;  %3044 = vmatprep.subr.bf16.mxu0 %v3043_v46 }
 0x1ef   : > { %2972 = vmatprep.subr.bf16.mxu1 %v2971_v51 }
 0x1f1   : > { %3046 = vmatpush3.bf16.msra.mxu0 %v3043_v46 }
 0x1f2   : > { %2974 = vmatpush3.bf16.msra.mxu1 %v2971_v51 }
 0x1f3   : > { %2976 = vmatprep.subr.bf16.mxu1 %v2975_v54 }
 0x1f6   : > { %2978 = vmatpush3.bf16.msra.mxu1 %v2975_v54 }
 0x1f7   : > { %2980 = vmatprep.subr.bf16.mxu1 %v2979_v57 }
 0x1fa   : > { %2982 = vmatpush3.bf16.msra.mxu1 %v2979_v57 }
 0x1fb   : > { %2984 = vmatprep.subr.bf16.mxu1 %v2983_v60 }
 0x1fd   : > { %2635 = vmatmul.mubr.f32.vlgmr.msra.gmra.mrb[2].mxu1 %v1632_v0 }
 0x1fe   : > { %2986 = vmatpush3.bf16.msra.mxu1 %v2983_v60  ;;  %2669 = vmatprep.mubr.f32.mxu1 %v1727_v3 }
 0x1ff   : > { %2988 = vmatprep.subr.bf16.mxu1 %v2987_v63 }
 0x202   : > { %2990 = vmatpush3.bf16.msra.mxu1 %v2987_v63 }
 0x203   : > { %2992 = vmatprep.subr.bf16.mxu1 %v2991_v4 }
 0x206   : > { %2994 = vmatpush3.bf16.msra.mxu1 %v2991_v4 }
 0x207   : > { %2996 = vmatprep.subr.bf16.mxu1 %v2995_v7 }
 0x20a   : > { %2998 = vmatpush3.bf16.msra.mxu1 %v2995_v7 }
 0x20b   : > { %3000 = vmatprep.subr.bf16.mxu1 %v2999_v10 }
 0x20e   : > { %3002 = vmatpush3.bf16.msra.mxu1 %v2999_v10 }
 0x20f   : > { %3004 = vmatprep.subr.bf16.mxu1 %v3003_v13 }
 0x212   : > { %3006 = vmatpush3.bf16.msra.mxu1 %v3003_v13 }
 0x213   : > { %3008 = vmatprep.subr.bf16.mxu1 %v3007_v16 }
 0x216   : > { %3010 = vmatpush3.bf16.msra.mxu1 %v3007_v16 }
 0x217   : > { %3012 = vmatprep.subr.bf16.mxu1 %v3011_v26 }
 0x21a   : > { %3014 = vmatpush3.bf16.msra.mxu1 %v3011_v26 }
 0x21d   : > { %2670 = vmatmul.mubr.f32.vlgmr.msra.gmra.mrb[2].mxu1 %v1728_v36 }
 0x28f   : > { %v2496_v47 = vpop.f32.mrb[2].mxu0 }
 0x290   : > { %v1334_v48 = vpop.f32.mrb[3].mxu0 }
 0x2f0   : > { %v2671_v49 = vpop.f32.mrb[2].mxu1 }
 0x2f1   : > { %v3049_v51 = vadd.f32 %v2671_v49, %v2496_v47  ;;  %v1812_v52 = vpop.f32.mrb[3].mxu1 }
 0x2f2   : > { %v3050_v53 = vadd.f32 %v1812_v52, %v1334_v48 }
 0x2f3   : > { %v1831_v54 = vadd.f32 %v3049_v51, %v2110_v50 }
 0x2f4   : > { %v1830_v56 = vadd.f32 %v3050_v53, %v2110_v50 }
 0x2f5   : > { %v1833_v57 = vmax.f32 %v1831_v54, 0.0 }
 0x2f6   : > { %v1832_v59 = vmax.f32 %v1830_v56, 0.0 }
 0x2f7   : > { %v1842_v60 = vmul.f32 %v2111_v55, %v1833_v57 }
 0x2f8   : > { %v1841_v61 = vmul.f32 %v2111_v55, %v1832_v59 }
 0x2f9   : > { %v1851_v62 = vadd.f32 %v2112_v58, %v1842_v60 }
 0x2fa   : > { %v1850_v63 = vadd.f32 %v2112_v58, %v1841_v61 }
 0x2fb   : > { %v1853_v1 = vadd.f32 %v1851_v62, %v3583_v19  ;;  %v2115_v19 = vld [vmem:[%s3706_s18] ss:$0 sm:$0xff] }
 0x2fc   : > { %v1852_v0 = vadd.f32 %v1850_v63, %v3585_v20 }
 0x2fe   : > { %2704 = vmatprep.mubr.f32.mxu0 %v1852_v0 }
 0x2ff   : > { %2705 = vmatmul.mubr.f32.vlgmr.msra.gmra.mrb[4].mxu0 %v1853_v1 }
 0x3d2   : > { %v2706_v3 = vpop.f32.mrb[4].mxu0 }
 0x3d3   : > { %v1949_v4 = vadd.f32 %v2706_v3, %v2113_v2  ;;  %v1943_v5 = vpop.f32.mrb[5].mxu0 }
 0x3d4   : > { %v1944_v7 = vadd.f32 %v2113_v2, %v1943_v5 }
 0x3d5   : > { %v1953_v20 = vmax.f32 %v1949_v4, 0.0 }
 0x3d6   : > { %v1952_v8 = vmax.f32 %v1944_v7, 0.0 }
 0x3d7   : > { %v1962_v9 = vmul.f32 %v2114_v6, %v1953_v20 }
 0x3d8   : > { %v1961_v10 = vmul.f32 %v2114_v6, %v1952_v8 }
 0x3d9   : > { %v1971_v11 = vadd.f32 %v2115_v19, %v1962_v9 }
 0x3da   : > { %v1970_v12 = vadd.f32 %v2115_v19, %v1961_v10 }
 0x3db   : > { %1973 = vst [vmem:[%s477_s21 + $0x8] sm:$0xff] %v1971_v11 }
 0x3dc   : > { %1972 = vst [vmem:[%s477_s21] sm:$0xff] %v1970_v12 }
 0x3dd   : > { %3244 = shalt.err (!%p3241_p9)
}
 0x3de   : > { %s3245_s25 = scalar_lea.hbm %s3618_s12, 256  ;;  %s3249_s28 = scalar_lea.hbm %s3708_s30, 512 }
 0x3df   : > { %p3246_p2 = scmp.ne.s32.totalorder %s3618_s12, %s3245_s25  ;;  %p3250_p5 = scmp.lt.u32.totalorder %s3618_s12, %s3708_s30 }
 0x3e0   : > { %p3251_p10 = scmp.lt.u32.totalorder %s3249_s28, %s3245_s25  ;;  %p3253_p12 = scmp.lt.u32.totalorder %s3245_s25, %s3618_s12 }
 0x3e1   : > { %p3247_p0 = pnand %p3246_p2, %p3709_p7 }
 0x3e2   : > { %p3252_p4 = por %p3251_p10, %p3250_p5 }
 0x3e3   : > { %p3248_p3 = pneg %p3247_p0 }
 0x3e4   : > { %p3254_p8 = por %p3253_p12, %p3252_p4 }
 0x3e6   : > { %p3255_p11 = pnand %p3254_p8, %p3248_p3 }
 0x3e8   : > { %3258 = shalt.err (!%p3255_p11)
}
 0x3e9   : > { %s3310_s15 = smov 128   ;;  %s3311_s27 = smov 8  }
 0x3ea   : > { %3084 = dma.vmem_to_hbm [thread:$0]  (%p3709_p7), %s3613_s24, 256, %s3618_s12, %s3620_s23, %s3310_s15, %s3310_s15, %s3311_s27  }
 0x3eb PF: > { %s3710_s22 = sld [smem:[#allocation15_spill]]  ;;  %s3711_s16 = sld [smem:[#allocation13_spill]] }
 0x3ec   : > { %s3712_s29 = sld [smem:[#allocation19_spill]] }
 0x3f1   : > { %p3106_p13 = scmp.ge.s32.totalorder %s3710_s22, 2  ;;  %s2003_s20 = sand.u32 1, %s3711_s16  }
 0x3f2   : > { %p3713_p1 = scmp.ne.s32.totalorder %s3712_s29, 0  ;;  %s2004_s17 = scalar_lea.sflag [#allocation5], %s2003_s20 }
 0x3f4   : > { %p3097_p6 = pnand %p3106_p13, %p3713_p1 }
 0x3f6   : > { %3284 = dma.done.wait (!%p3097_p6), %s2004_s17, 256  }
 0x3f7   : > { %3286 = vsyncadd (!%p3097_p6), %s2004_s17, 4294967040  ;;  %s3714_s28 = sld [smem:[#allocation16_spill]]  ;;  %s3715_s14 = sld [smem:[#allocation14_spill]] }
 0x3f8   : > { %s3716_s27 = sld [smem:[#allocation17_spill]]  ;;  %s3717_s25 = smov %s3293_s26 }
 0x3fd   : > { %p25_p9 = scmp.ge.s32.totalorder %s3714_s28, 4   ;;  %s3718_s26 = smov %s3715_s14 }
 0x3ff   :  { %27 = sbr.rel (!%p25_p9) target bundleno = 8 (0x8), region = 132 }
 0x406   :  { %2009 = vsyncpa [#allocation4], 1 }
 0x407   :  { %2011 = vsyncpa [#allocation4 + $0x1], 1 }
 0x408   :  { %2012 = vsyncpa [#allocation7], 1 }
 0x409   :  { %2013 = vsyncpa [#allocation5], 1 }
 0x40a   :  { %2015 = vsyncpa [#allocation5 + $0x1], 1 }

</bundles_post_ra>
